<compile_context>
chip_gen: v6e
topology: v6e:2x2x1
jax: 0.10.0
libtpu: 0.0.40
codegen_flags: <defaults>
</compile_context>

<pallas_src>
import jax
import jax.numpy as jnp
from jax import lax
from jax.experimental import pallas as pl
from jax.experimental.pallas import tpu as pltpu


def encoder_gru_fc_kernel(
    x_ref,       # (S*BP, I)     whole sequence, batch-padded, seq-major rows
    h0_ref,      # (BP, HP)      initial hidden (lane-padded)
    wih_ref,     # (I, 3*HP)     fused W_ih^T, per-gate columns at 0/HP/2HP
    whh_ref,     # (HP, 3*HP)    fused W_hh^T, per-gate columns at 0/HP/2HP
    bi_ref,      # (1, 3*HP)     input-side bias (r/z already folded with b_hh)
    bh_ref,      # (1, 3*HP)     hidden-side bias (only the n gate is nonzero)
    wfc_ref,     # (HP, OP)      fc.weight^T, lane-padded
    bfc_ref,     # (1, OP)       fc.bias, lane-padded
    out_ref,     # (S*BP, OP)    fc(GRU outputs), lane-dense
    hlast_ref,   # (BP, HP)      final hidden state
    gi_ref,      # (S*BP, 3*HP)  scratch: fused precomputed x-projections
    hs_ref,      # (S*BP, HP)    scratch: all hidden states
):
    SB = x_ref.shape[0]
    BP, HP = h0_ref.shape
    S = SB // BP

    # ---- Off the serial path: ONE fused input projection for the sequence. --
    gi_ref[...] = (
        jnp.dot(x_ref[...], wih_ref[...], preferred_element_type=jnp.float32)
        + bi_ref[...]
    )

    def sigmoid_eup(a):
        # exp and the reciprocal seed run on the EUP slot (free relative to the
        # serial MXU chain); one Newton step (VPU) restores full fp32 accuracy.
        e = jnp.exp(-jnp.maximum(a, -30.0))     # clamp keeps den finite for NR
        den = 1.0 + e
        y = pl.reciprocal(den, approx=True)
        return y * (2.0 - den * y)

    # ---- Serial recurrence: one fused (BP,HP)@(HP,3HP) matmul per step. -----
    def step(t, h_prev):
        row = pl.multiple_of(t * BP, BP)        # sublane-aligned row offset
        sl = pl.ds(row, BP)
        gi = gi_ref[sl, :]                      # (BP, 3*HP), lane-aligned read
        gh = (
            jnp.dot(h_prev, whh_ref[...], preferred_element_type=jnp.float32)
            + bh_ref[...]
        )
        r = sigmoid_eup(gi[:, 0:HP] + gh[:, 0:HP])
        z = sigmoid_eup(gi[:, HP:2 * HP] + gh[:, HP:2 * HP])
        n = jnp.tanh(gi[:, 2 * HP:3 * HP] + r * gh[:, 2 * HP:3 * HP])
        h_new = (1.0 - z) * n + z * h_prev
        hs_ref[sl, :] = h_new                   # unmasked (BP, HP) store
        return h_new

    # Full unroll at small S gives the LLO scheduler visibility.
    # TODO(synk): switch to unroll=2..4 (or a time-chunk grid axis) at large S.
    h_last = lax.fori_loop(0, S, step, h0_ref[...], unroll=True)
    hlast_ref[...] = h_last

    # ---- FC head: one matmul over all timesteps, single lane-dense store. ---
    out_ref[...] = (
        jnp.dot(hs_ref[...], wfc_ref[...], preferred_element_type=jnp.float32)
        + bfc_ref[...]
    )


@jax.jit
def encoder_rnn_forward(inputs, hidden, params):
    """inputs: (S, B, I) f32; hidden: (1, B, H) f32.
    Returns (output (S, B, O), hidden (1, B, H)) — same as EncoderRNN.forward."""
    S, B, I = inputs.shape
    H = hidden.shape[-1]
    O = params["w_fc"].shape[0]

    BP = max(8, ((B + 7) // 8) * 8)        # sublane-pad batch
    HP = ((H + 127) // 128) * 128          # lane-pad hidden (per gate)
    OP = ((O + 127) // 128) * 128          # lane-pad fc output

    x_p = jnp.zeros((S, BP, I), jnp.float32).at[:, :B, :].set(inputs)
    x2d = x_p.reshape(S * BP, I)           # seq-major rows: [t*BP, (t+1)*BP)
    h0_p = jnp.zeros((BP, HP), jnp.float32).at[:B, :H].set(hidden[0])

    w_ih, w_hh = params["w_ih"], params["w_hh"]
    b_ih, b_hh = params["b_ih"], params["b_hh"]

    # Fused, lane-padded weight layout (PyTorch gate order r, z, n):
    # gate g occupies lanes [g*HP, g*HP + H); all pad lanes / rows are zero.
    wih_cat = jnp.zeros((I, 3 * HP), jnp.float32)
    whh_cat = jnp.zeros((HP, 3 * HP), jnp.float32)
    for g in range(3):
        col = g * HP
        wih_cat = wih_cat.at[:, col:col + H].set(w_ih[g * H:(g + 1) * H].T)
        whh_cat = whh_cat.at[:H, col:col + H].set(w_hh[g * H:(g + 1) * H].T)

    # Fold b_ih + b_hh for r/z; keep n biases split (b_hh_n sits inside r*()).
    bi_cat = jnp.zeros((1, 3 * HP), jnp.float32)
    bi_cat = bi_cat.at[0, 0:H].set(b_ih[0:H] + b_hh[0:H])
    bi_cat = bi_cat.at[0, HP:HP + H].set(b_ih[H:2 * H] + b_hh[H:2 * H])
    bi_cat = bi_cat.at[0, 2 * HP:2 * HP + H].set(b_ih[2 * H:3 * H])
    bh_cat = jnp.zeros((1, 3 * HP), jnp.float32)
    bh_cat = bh_cat.at[0, 2 * HP:2 * HP + H].set(b_hh[2 * H:3 * H])

    wfc_p = jnp.zeros((HP, OP), jnp.float32).at[:H, :O].set(params["w_fc"].T)
    bfc_p = jnp.zeros((1, OP), jnp.float32).at[0, :O].set(params["b_fc"])

    out2d, h_last_p = pl.pallas_call(
        encoder_gru_fc_kernel,
        out_shape=(
            jax.ShapeDtypeStruct((S * BP, OP), jnp.float32),
            jax.ShapeDtypeStruct((BP, HP), jnp.float32),
        ),
        # Single invocation (no grid): all operands are whole-array VMEM blocks.
        scratch_shapes=[
            pltpu.VMEM((S * BP, 3 * HP), jnp.float32),   # fused gi
            pltpu.VMEM((S * BP, HP), jnp.float32),       # all hidden states
        ],
        compiler_params=pltpu.CompilerParams(vmem_limit_bytes=32 * 1024 * 1024),
    )(x2d, h0_p, wih_cat, whh_cat, bi_cat, bh_cat, wfc_p, bfc_p)

    out = out2d.reshape(S, BP, OP)[:, :B, :O]
    h_last = h_last_p[:B, :H][None, :, :]
    return out, h_last


def reference_forward(inputs, hidden, params):
    """Pure-JAX reference of the PyTorch EncoderRNN.forward."""
    H = hidden.shape[-1]
    w_ih, w_hh = params["w_ih"], params["w_hh"]
    b_ih, b_hh = params["b_ih"], params["b_hh"]

    def step(h, x_t):
        gi = x_t @ w_ih.T + b_ih
        gh = h @ w_hh.T + b_hh
        r = jax.nn.sigmoid(gi[:, :H] + gh[:, :H])
        z = jax.nn.sigmoid(gi[:, H:2 * H] + gh[:, H:2 * H])
        n = jnp.tanh(gi[:, 2 * H:] + r * gh[:, 2 * H:])
        h_new = (1.0 - z) * n + z * h
        return h_new, h_new

    h_last, hs = lax.scan(step, hidden[0], inputs)
    out = hs @ params["w_fc"].T + params["b_fc"]
    return out, h_last[None]


def init_params(key, input_size, hidden_size, output_size):
    """Deterministic PyTorch-style uniform(-1/sqrt(H), 1/sqrt(H)) init."""
    ks = jax.random.split(key, 6)
    bound = 1.0 / jnp.sqrt(jnp.float32(hidden_size))
    u = lambda k, shape: jax.random.uniform(k, shape, jnp.float32, -bound, bound)
    return {
        "w_ih": u(ks[0], (3 * hidden_size, input_size)),
        "w_hh": u(ks[1], (3 * hidden_size, hidden_size)),
        "b_ih": u(ks[2], (3 * hidden_size,)),
        "b_hh": u(ks[3], (3 * hidden_size,)),
        "w_fc": u(ks[4], (output_size, hidden_size)),
        "b_fc": u(ks[5], (output_size,)),
    }


if __name__ == "__main__":
    # Shapes consistent with the module's forward:
    # inputs (seq_len, batch, input_size), hidden (n_layers=1, batch, hidden)
    SEQ, BATCH, INPUT, HIDDEN, OUTPUT = 8, 2, 16, 32, 8

    key = jax.random.PRNGKey(0)
    k_x, k_p = jax.random.split(key)
    params = init_params(k_p, INPUT, HIDDEN, OUTPUT)

    inputs = jax.random.normal(k_x, (SEQ, BATCH, INPUT), jnp.float32)
    hidden0 = jnp.zeros((1, BATCH, HIDDEN), jnp.float32)   # EncoderRNN.init_hidden()

    out, h_last = jax.block_until_ready(encoder_rnn_forward(inputs, hidden0, params))

    # Sanity check against pure-JAX reference of the same math.
    ref_out, ref_h = reference_forward(inputs, hidden0, params)
    assert out.shape == (SEQ, BATCH, OUTPUT)
    assert h_last.shape == (1, BATCH, HIDDEN)
    assert jnp.allclose(out, ref_out, atol=1e-4, rtol=1e-4)
    assert jnp.allclose(h_last, ref_h, atol=1e-4, rtol=1e-4)

    print("KERNEL_OK")
</pallas_src>

<mosaic_0001>
module attributes {stable_mosaic.version = 11 : i64} {
  func.func @encoder_gru_fc_kernel(%arg0: memref<64x16xf32, #tpu.memory_space<vmem>>, %arg1: memref<8x128xf32, #tpu.memory_space<vmem>>, %arg2: memref<16x384xf32, #tpu.memory_space<vmem>>, %arg3: memref<128x384xf32, #tpu.memory_space<vmem>>, %arg4: memref<1x384xf32, #tpu.memory_space<vmem>>, %arg5: memref<1x384xf32, #tpu.memory_space<vmem>>, %arg6: memref<128x128xf32, #tpu.memory_space<vmem>>, %arg7: memref<1x128xf32, #tpu.memory_space<vmem>>, %arg8: memref<64x128xf32, #tpu.memory_space<vmem>>, %arg9: memref<8x128xf32, #tpu.memory_space<vmem>>, %arg10: memref<64x384xf32, #tpu.memory_space<vmem>>, %arg11: memref<64x128xf32, #tpu.memory_space<vmem>>) attributes {dimension_semantics = [], scalar_prefetch = 0 : i64, scratch_operands = 2 : i64, tpu.core_type = #tpu.core_type<tc>} {
    %c0 = arith.constant 0 : index
    %c0_0 = arith.constant 0 : index
    %0 = vector.load %arg0[%c0, %c0_0] : memref<64x16xf32, #tpu.memory_space<vmem>>, vector<64x16xf32>
    %c0_1 = arith.constant 0 : index
    %c0_2 = arith.constant 0 : index
    %1 = vector.load %arg2[%c0_1, %c0_2] : memref<16x384xf32, #tpu.memory_space<vmem>>, vector<16x384xf32>
    %cst = arith.constant dense<0.000000e+00> : vector<64x384xf32>
    %2 = tpu.matmul %0, %1, %cst {dimension_numbers = #tpu.dot_dimension_numbers<[1], [0], [0], [1], [0, 0, 1, 1], [], []>} : vector<64x16xf32>, vector<16x384xf32>, vector<64x384xf32> -> vector<64x384xf32>
    %c0_3 = arith.constant 0 : index
    %c0_4 = arith.constant 0 : index
    %3 = vector.load %arg4[%c0_3, %c0_4] : memref<1x384xf32, #tpu.memory_space<vmem>>, vector<1x384xf32>
    %4 = vector.broadcast %3 : vector<1x384xf32> to vector<64x384xf32>
    %5 = arith.addf %2, %4 : vector<64x384xf32>
    %c0_5 = arith.constant 0 : index
    %c0_6 = arith.constant 0 : index
    %6 = vector.load %arg10[%c0_5, %c0_6] : memref<64x384xf32, #tpu.memory_space<vmem>>, vector<64x384xf32>
    tpu.vector_store %arg10[%c0_5, %c0_6], %5 {strides = array<i32>} : memref<64x384xf32, #tpu.memory_space<vmem>>, vector<64x384xf32>,
    %c0_7 = arith.constant 0 : index
    %c0_8 = arith.constant 0 : index
    %7 = vector.load %arg1[%c0_7, %c0_8] : memref<8x128xf32, #tpu.memory_space<vmem>>, vector<8x128xf32>
    %c0_i32 = arith.constant 0 : i32
    %c8_i32 = arith.constant 8 : i32
    %8 = arith.muli %c0_i32, %c8_i32 : i32
    %9 = tpu.assume_multiple %8, 8 : i32
    %10 = arith.index_cast %9 : i32 to index
    %c0_9 = arith.constant 0 : index
    %11 = vector.load %arg10[%10, %c0_9] : memref<64x384xf32, #tpu.memory_space<vmem>>, vector<8x384xf32>
    %c0_10 = arith.constant 0 : index
    %c0_11 = arith.constant 0 : index
    %12 = vector.load %arg3[%c0_10, %c0_11] : memref<128x384xf32, #tpu.memory_space<vmem>>, vector<128x384xf32>
    %cst_12 = arith.constant dense<0.000000e+00> : vector<8x384xf32>
    %13 = tpu.matmul %7, %12, %cst_12 {dimension_numbers = #tpu.dot_dimension_numbers<[1], [0], [0], [1], [0, 0, 1, 1], [], []>} : vector<8x128xf32>, vector<128x384xf32>, vector<8x384xf32> -> vector<8x384xf32>
    %c0_13 = arith.constant 0 : index
    %c0_14 = arith.constant 0 : index
    %14 = vector.load %arg5[%c0_13, %c0_14] : memref<1x384xf32, #tpu.memory_space<vmem>>, vector<1x384xf32>
    %15 = vector.broadcast %14 : vector<1x384xf32> to vector<8x384xf32>
    %16 = arith.addf %13, %15 : vector<8x384xf32>
    %17 = vector.extract_strided_slice %11 {offsets = [0, 0], sizes = [8, 128], strides = [1, 1]} : vector<8x384xf32> to vector<8x128xf32>
    %18 = vector.extract_strided_slice %16 {offsets = [0, 0], sizes = [8, 128], strides = [1, 1]} : vector<8x384xf32> to vector<8x128xf32>
    %19 = arith.addf %17, %18 : vector<8x128xf32>
    %cst_15 = arith.constant -3.000000e+01 : f32
    %20 = vector.broadcast %cst_15 : f32 to vector<8x128xf32>
    %21 = arith.maximumf %19, %20 : vector<8x128xf32>
    %cst_16 = arith.constant 0.000000e+00 : f32
    %22 = vector.broadcast %cst_16 : f32 to vector<8x128xf32>
    %23 = arith.subf %22, %21 : vector<8x128xf32>
    %24 = math.exp %23 : vector<8x128xf32>
    %cst_17 = arith.constant 1.000000e+00 : f32
    %25 = vector.broadcast %cst_17 : f32 to vector<8x128xf32>
    %26 = arith.addf %25, %24 : vector<8x128xf32>
    %27 = tpu.reciprocal %26 {approx = true} : vector<8x128xf32> -> vector<8x128xf32>
    %28 = arith.mulf %26, %27 : vector<8x128xf32>
    %cst_18 = arith.constant 2.000000e+00 : f32
    %29 = vector.broadcast %cst_18 : f32 to vector<8x128xf32>
    %30 = arith.subf %29, %28 : vector<8x128xf32>
    %31 = arith.mulf %27, %30 : vector<8x128xf32>
    %32 = vector.extract_strided_slice %11 {offsets = [0, 128], sizes = [8, 128], strides = [1, 1]} : vector<8x384xf32> to vector<8x128xf32>
    %33 = vector.extract_strided_slice %16 {offsets = [0, 128], sizes = [8, 128], strides = [1, 1]} : vector<8x384xf32> to vector<8x128xf32>
    %34 = arith.addf %32, %33 : vector<8x128xf32>
    %cst_19 = arith.constant -3.000000e+01 : f32
    %35 = vector.broadcast %cst_19 : f32 to vector<8x128xf32>
    %36 = arith.maximumf %34, %35 : vector<8x128xf32>
    %cst_20 = arith.constant 0.000000e+00 : f32
    %37 = vector.broadcast %cst_20 : f32 to vector<8x128xf32>
    %38 = arith.subf %37, %36 : vector<8x128xf32>
    %39 = math.exp %38 : vector<8x128xf32>
    %cst_21 = arith.constant 1.000000e+00 : f32
    %40 = vector.broadcast %cst_21 : f32 to vector<8x128xf32>
    %41 = arith.addf %40, %39 : vector<8x128xf32>
    %42 = tpu.reciprocal %41 {approx = true} : vector<8x128xf32> -> vector<8x128xf32>
    %43 = arith.mulf %41, %42 : vector<8x128xf32>
    %cst_22 = arith.constant 2.000000e+00 : f32
    %44 = vector.broadcast %cst_22 : f32 to vector<8x128xf32>
    %45 = arith.subf %44, %43 : vector<8x128xf32>
    %46 = arith.mulf %42, %45 : vector<8x128xf32>
    %47 = vector.extract_strided_slice %11 {offsets = [0, 256], sizes = [8, 128], strides = [1, 1]} : vector<8x384xf32> to vector<8x128xf32>
    %48 = vector.extract_strided_slice %16 {offsets = [0, 256], sizes = [8, 128], strides = [1, 1]} : vector<8x384xf32> to vector<8x128xf32>
    %49 = arith.mulf %31, %48 : vector<8x128xf32>
    %50 = arith.addf %47, %49 : vector<8x128xf32>
    %51 = math.tanh %50 : vector<8x128xf32>
    %cst_23 = arith.constant 1.000000e+00 : f32
    %52 = vector.broadcast %cst_23 : f32 to vector<8x128xf32>
    %53 = arith.subf %52, %46 : vector<8x128xf32>
    %54 = arith.mulf %53, %51 : vector<8x128xf32>
    %55 = arith.mulf %46, %7 : vector<8x128xf32>
    %56 = arith.addf %54, %55 : vector<8x128xf32>
    %57 = arith.index_cast %9 : i32 to index
    %c0_24 = arith.constant 0 : index
    %58 = vector.load %arg11[%57, %c0_24] : memref<64x128xf32, #tpu.memory_space<vmem>>, vector<8x128xf32>
    tpu.vector_store %arg11[%57, %c0_24], %56 {strides = array<i32>} : memref<64x128xf32, #tpu.memory_space<vmem>>, vector<8x128xf32>,
    %c1_i32 = arith.constant 1 : i32
    %c8_i32_25 = arith.constant 8 : i32
    %59 = arith.muli %c1_i32, %c8_i32_25 : i32
    %60 = tpu.assume_multiple %59, 8 : i32
    %61 = arith.index_cast %60 : i32 to index
    %c0_26 = arith.constant 0 : index
    %62 = vector.load %arg10[%61, %c0_26] : memref<64x384xf32, #tpu.memory_space<vmem>>, vector<8x384xf32>
    %c0_27 = arith.constant 0 : index
    %c0_28 = arith.constant 0 : index
    %63 = vector.load %arg3[%c0_27, %c0_28] : memref<128x384xf32, #tpu.memory_space<vmem>>, vector<128x384xf32>
    %cst_29 = arith.constant dense<0.000000e+00> : vector<8x384xf32>
    %64 = tpu.matmul %56, %63, %cst_29 {dimension_numbers = #tpu.dot_dimension_numbers<[1], [0], [0], [1], [0, 0, 1, 1], [], []>} : vector<8x128xf32>, vector<128x384xf32>, vector<8x384xf32> -> vector<8x384xf32>
    %c0_30 = arith.constant 0 : index
    %c0_31 = arith.constant 0 : index
    %65 = vector.load %arg5[%c0_30, %c0_31] : memref<1x384xf32, #tpu.memory_space<vmem>>, vector<1x384xf32>
    %66 = vector.broadcast %65 : vector<1x384xf32> to vector<8x384xf32>
    %67 = arith.addf %64, %66 : vector<8x384xf32>
    %68 = vector.extract_strided_slice %62 {offsets = [0, 0], sizes = [8, 128], strides = [1, 1]} : vector<8x384xf32> to vector<8x128xf32>
    %69 = vector.extract_strided_slice %67 {offsets = [0, 0], sizes = [8, 128], strides = [1, 1]} : vector<8x384xf32> to vector<8x128xf32>
    %70 = arith.addf %68, %69 : vector<8x128xf32>
    %cst_32 = arith.constant -3.000000e+01 : f32
    %71 = vector.broadcast %cst_32 : f32 to vector<8x128xf32>
    %72 = arith.maximumf %70, %71 : vector<8x128xf32>
    %cst_33 = arith.constant 0.000000e+00 : f32
    %73 = vector.broadcast %cst_33 : f32 to vector<8x128xf32>
    %74 = arith.subf %73, %72 : vector<8x128xf32>
    %75 = math.exp %74 : vector<8x128xf32>
    %cst_34 = arith.constant 1.000000e+00 : f32
    %76 = vector.broadcast %cst_34 : f32 to vector<8x128xf32>
    %77 = arith.addf %76, %75 : vector<8x128xf32>
    %78 = tpu.reciprocal %77 {approx = true} : vector<8x128xf32> -> vector<8x128xf32>
    %79 = arith.mulf %77, %78 : vector<8x128xf32>
    %cst_35 = arith.constant 2.000000e+00 : f32
    %80 = vector.broadcast %cst_35 : f32 to vector<8x128xf32>
    %81 = arith.subf %80, %79 : vector<8x128xf32>
    %82 = arith.mulf %78, %81 : vector<8x128xf32>
    %83 = vector.extract_strided_slice %62 {offsets = [0, 128], sizes = [8, 128], strides = [1, 1]} : vector<8x384xf32> to vector<8x128xf32>
    %84 = vector.extract_strided_slice %67 {offsets = [0, 128], sizes = [8, 128], strides = [1, 1]} : vector<8x384xf32> to vector<8x128xf32>
    %85 = arith.addf %83, %84 : vector<8x128xf32>
    %cst_36 = arith.constant -3.000000e+01 : f32
    %86 = vector.broadcast %cst_36 : f32 to vector<8x128xf32>
    %87 = arith.maximumf %85, %86 : vector<8x128xf32>
    %cst_37 = arith.constant 0.000000e+00 : f32
    %88 = vector.broadcast %cst_37 : f32 to vector<8x128xf32>
    %89 = arith.subf %88, %87 : vector<8x128xf32>
    %90 = math.exp %89 : vector<8x128xf32>
    %cst_38 = arith.constant 1.000000e+00 : f32
    %91 = vector.broadcast %cst_38 : f32 to vector<8x128xf32>
    %92 = arith.addf %91, %90 : vector<8x128xf32>
    %93 = tpu.reciprocal %92 {approx = true} : vector<8x128xf32> -> vector<8x128xf32>
    %94 = arith.mulf %92, %93 : vector<8x128xf32>
    %cst_39 = arith.constant 2.000000e+00 : f32
    %95 = vector.broadcast %cst_39 : f32 to vector<8x128xf32>
    %96 = arith.subf %95, %94 : vector<8x128xf32>
    %97 = arith.mulf %93, %96 : vector<8x128xf32>
    %98 = vector.extract_strided_slice %62 {offsets = [0, 256], sizes = [8, 128], strides = [1, 1]} : vector<8x384xf32> to vector<8x128xf32>
    %99 = vector.extract_strided_slice %67 {offsets = [0, 256], sizes = [8, 128], strides = [1, 1]} : vector<8x384xf32> to vector<8x128xf32>
    %100 = arith.mulf %82, %99 : vector<8x128xf32>
    %101 = arith.addf %98, %100 : vector<8x128xf32>
    %102 = math.tanh %101 : vector<8x128xf32>
    %cst_40 = arith.constant 1.000000e+00 : f32
    %103 = vector.broadcast %cst_40 : f32 to vector<8x128xf32>
    %104 = arith.subf %103, %97 : vector<8x128xf32>
    %105 = arith.mulf %104, %102 : vector<8x128xf32>
    %106 = arith.mulf %97, %56 : vector<8x128xf32>
    %107 = arith.addf %105, %106 : vector<8x128xf32>
    %108 = arith.index_cast %60 : i32 to index
    %c0_41 = arith.constant 0 : index
    %109 = vector.load %arg11[%108, %c0_41] : memref<64x128xf32, #tpu.memory_space<vmem>>, vector<8x128xf32>
    tpu.vector_store %arg11[%108, %c0_41], %107 {strides = array<i32>} : memref<64x128xf32, #tpu.memory_space<vmem>>, vector<8x128xf32>,
    %c2_i32 = arith.constant 2 : i32
    %c8_i32_42 = arith.constant 8 : i32
    %110 = arith.muli %c2_i32, %c8_i32_42 : i32
    %111 = tpu.assume_multiple %110, 8 : i32
    %112 = arith.index_cast %111 : i32 to index
    %c0_43 = arith.constant 0 : index
    %113 = vector.load %arg10[%112, %c0_43] : memref<64x384xf32, #tpu.memory_space<vmem>>, vector<8x384xf32>
    %c0_44 = arith.constant 0 : index
    %c0_45 = arith.constant 0 : index
    %114 = vector.load %arg3[%c0_44, %c0_45] : memref<128x384xf32, #tpu.memory_space<vmem>>, vector<128x384xf32>
    %cst_46 = arith.constant dense<0.000000e+00> : vector<8x384xf32>
    %115 = tpu.matmul %107, %114, %cst_46 {dimension_numbers = #tpu.dot_dimension_numbers<[1], [0], [0], [1], [0, 0, 1, 1], [], []>} : vector<8x128xf32>, vector<128x384xf32>, vector<8x384xf32> -> vector<8x384xf32>
    %c0_47 = arith.constant 0 : index
    %c0_48 = arith.constant 0 : index
    %116 = vector.load %arg5[%c0_47, %c0_48] : memref<1x384xf32, #tpu.memory_space<vmem>>, vector<1x384xf32>
    %117 = vector.broadcast %116 : vector<1x384xf32> to vector<8x384xf32>
    %118 = arith.addf %115, %117 : vector<8x384xf32>
    %119 = vector.extract_strided_slice %113 {offsets = [0, 0], sizes = [8, 128], strides = [1, 1]} : vector<8x384xf32> to vector<8x128xf32>
    %120 = vector.extract_strided_slice %118 {offsets = [0, 0], sizes = [8, 128], strides = [1, 1]} : vector<8x384xf32> to vector<8x128xf32>
    %121 = arith.addf %119, %120 : vector<8x128xf32>
    %cst_49 = arith.constant -3.000000e+01 : f32
    %122 = vector.broadcast %cst_49 : f32 to vector<8x128xf32>
    %123 = arith.maximumf %121, %122 : vector<8x128xf32>
    %cst_50 = arith.constant 0.000000e+00 : f32
    %124 = vector.broadcast %cst_50 : f32 to vector<8x128xf32>
    %125 = arith.subf %124, %123 : vector<8x128xf32>
    %126 = math.exp %125 : vector<8x128xf32>
    %cst_51 = arith.constant 1.000000e+00 : f32
    %127 = vector.broadcast %cst_51 : f32 to vector<8x128xf32>
    %128 = arith.addf %127, %126 : vector<8x128xf32>
    %129 = tpu.reciprocal %128 {approx = true} : vector<8x128xf32> -> vector<8x128xf32>
    %130 = arith.mulf %128, %129 : vector<8x128xf32>
    %cst_52 = arith.constant 2.000000e+00 : f32
    %131 = vector.broadcast %cst_52 : f32 to vector<8x128xf32>
    %132 = arith.subf %131, %130 : vector<8x128xf32>
    %133 = arith.mulf %129, %132 : vector<8x128xf32>
    %134 = vector.extract_strided_slice %113 {offsets = [0, 128], sizes = [8, 128], strides = [1, 1]} : vector<8x384xf32> to vector<8x128xf32>
    %135 = vector.extract_strided_slice %118 {offsets = [0, 128], sizes = [8, 128], strides = [1, 1]} : vector<8x384xf32> to vector<8x128xf32>
    %136 = arith.addf %134, %135 : vector<8x128xf32>
    %cst_53 = arith.constant -3.000000e+01 : f32
    %137 = vector.broadcast %cst_53 : f32 to vector<8x128xf32>
    %138 = arith.maximumf %136, %137 : vector<8x128xf32>
    %cst_54 = arith.constant 0.000000e+00 : f32
    %139 = vector.broadcast %cst_54 : f32 to vector<8x128xf32>
    %140 = arith.subf %139, %138 : vector<8x128xf32>
    %141 = math.exp %140 : vector<8x128xf32>
    %cst_55 = arith.constant 1.000000e+00 : f32
    %142 = vector.broadcast %cst_55 : f32 to vector<8x128xf32>
    %143 = arith.addf %142, %141 : vector<8x128xf32>
    %144 = tpu.reciprocal %143 {approx = true} : vector<8x128xf32> -> vector<8x128xf32>
    %145 = arith.mulf %143, %144 : vector<8x128xf32>
    %cst_56 = arith.constant 2.000000e+00 : f32
    %146 = vector.broadcast %cst_56 : f32 to vector<8x128xf32>
    %147 = arith.subf %146, %145 : vector<8x128xf32>
    %148 = arith.mulf %144, %147 : vector<8x128xf32>
    %149 = vector.extract_strided_slice %113 {offsets = [0, 256], sizes = [8, 128], strides = [1, 1]} : vector<8x384xf32> to vector<8x128xf32>
    %150 = vector.extract_strided_slice %118 {offsets = [0, 256], sizes = [8, 128], strides = [1, 1]} : vector<8x384xf32> to vector<8x128xf32>
    %151 = arith.mulf %133, %150 : vector<8x128xf32>
    %152 = arith.addf %149, %151 : vector<8x128xf32>
    %153 = math.tanh %152 : vector<8x128xf32>
    %cst_57 = arith.constant 1.000000e+00 : f32
    %154 = vector.broadcast %cst_57 : f32 to vector<8x128xf32>
    %155 = arith.subf %154, %148 : vector<8x128xf32>
    %156 = arith.mulf %155, %153 : vector<8x128xf32>
    %157 = arith.mulf %148, %107 : vector<8x128xf32>
    %158 = arith.addf %156, %157 : vector<8x128xf32>
    %159 = arith.index_cast %111 : i32 to index
    %c0_58 = arith.constant 0 : index
    %160 = vector.load %arg11[%159, %c0_58] : memref<64x128xf32, #tpu.memory_space<vmem>>, vector<8x128xf32>
    tpu.vector_store %arg11[%159, %c0_58], %158 {strides = array<i32>} : memref<64x128xf32, #tpu.memory_space<vmem>>, vector<8x128xf32>,
    %c3_i32 = arith.constant 3 : i32
    %c8_i32_59 = arith.constant 8 : i32
    %161 = arith.muli %c3_i32, %c8_i32_59 : i32
    %162 = tpu.assume_multiple %161, 8 : i32
    %163 = arith.index_cast %162 : i32 to index
    %c0_60 = arith.constant 0 : index
    %164 = vector.load %arg10[%163, %c0_60] : memref<64x384xf32, #tpu.memory_space<vmem>>, vector<8x384xf32>
    %c0_61 = arith.constant 0 : index
    %c0_62 = arith.constant 0 : index
    %165 = vector.load %arg3[%c0_61, %c0_62] : memref<128x384xf32, #tpu.memory_space<vmem>>, vector<128x384xf32>
    %cst_63 = arith.constant dense<0.000000e+00> : vector<8x384xf32>
    %166 = tpu.matmul %158, %165, %cst_63 {dimension_numbers = #tpu.dot_dimension_numbers<[1], [0], [0], [1], [0, 0, 1, 1], [], []>} : vector<8x128xf32>, vector<128x384xf32>, vector<8x384xf32> -> vector<8x384xf32>
    %c0_64 = arith.constant 0 : index
    %c0_65 = arith.constant 0 : index
    %167 = vector.load %arg5[%c0_64, %c0_65] : memref<1x384xf32, #tpu.memory_space<vmem>>, vector<1x384xf32>
    %168 = vector.broadcast %167 : vector<1x384xf32> to vector<8x384xf32>
    %169 = arith.addf %166, %168 : vector<8x384xf32>
    %170 = vector.extract_strided_slice %164 {offsets = [0, 0], sizes = [8, 128], strides = [1, 1]} : vector<8x384xf32> to vector<8x128xf32>
    %171 = vector.extract_strided_slice %169 {offsets = [0, 0], sizes = [8, 128], strides = [1, 1]} : vector<8x384xf32> to vector<8x128xf32>
    %172 = arith.addf %170, %171 : vector<8x128xf32>
    %cst_66 = arith.constant -3.000000e+01 : f32
    %173 = vector.broadcast %cst_66 : f32 to vector<8x128xf32>
    %174 = arith.maximumf %172, %173 : vector<8x128xf32>
    %cst_67 = arith.constant 0.000000e+00 : f32
    %175 = vector.broadcast %cst_67 : f32 to vector<8x128xf32>
    %176 = arith.subf %175, %174 : vector<8x128xf32>
    %177 = math.exp %176 : vector<8x128xf32>
    %cst_68 = arith.constant 1.000000e+00 : f32
    %178 = vector.broadcast %cst_68 : f32 to vector<8x128xf32>
    %179 = arith.addf %178, %177 : vector<8x128xf32>
    %180 = tpu.reciprocal %179 {approx = true} : vector<8x128xf32> -> vector<8x128xf32>
    %181 = arith.mulf %179, %180 : vector<8x128xf32>
    %cst_69 = arith.constant 2.000000e+00 : f32
    %182 = vector.broadcast %cst_69 : f32 to vector<8x128xf32>
    %183 = arith.subf %182, %181 : vector<8x128xf32>
    %184 = arith.mulf %180, %183 : vector<8x128xf32>
    %185 = vector.extract_strided_slice %164 {offsets = [0, 128], sizes = [8, 128], strides = [1, 1]} : vector<8x384xf32> to vector<8x128xf32>
    %186 = vector.extract_strided_slice %169 {offsets = [0, 128], sizes = [8, 128], strides = [1, 1]} : vector<8x384xf32> to vector<8x128xf32>
    %187 = arith.addf %185, %186 : vector<8x128xf32>
    %cst_70 = arith.constant -3.000000e+01 : f32
    %188 = vector.broadcast %cst_70 : f32 to vector<8x128xf32>
    %189 = arith.maximumf %187, %188 : vector<8x128xf32>
    %cst_71 = arith.constant 0.000000e+00 : f32
    %190 = vector.broadcast %cst_71 : f32 to vector<8x128xf32>
    %191 = arith.subf %190, %189 : vector<8x128xf32>
    %192 = math.exp %191 : vector<8x128xf32>
    %cst_72 = arith.constant 1.000000e+00 : f32
    %193 = vector.broadcast %cst_72 : f32 to vector<8x128xf32>
    %194 = arith.addf %193, %192 : vector<8x128xf32>
    %195 = tpu.reciprocal %194 {approx = true} : vector<8x128xf32> -> vector<8x128xf32>
    %196 = arith.mulf %194, %195 : vector<8x128xf32>
    %cst_73 = arith.constant 2.000000e+00 : f32
    %197 = vector.broadcast %cst_73 : f32 to vector<8x128xf32>
    %198 = arith.subf %197, %196 : vector<8x128xf32>
    %199 = arith.mulf %195, %198 : vector<8x128xf32>
    %200 = vector.extract_strided_slice %164 {offsets = [0, 256], sizes = [8, 128], strides = [1, 1]} : vector<8x384xf32> to vector<8x128xf32>
    %201 = vector.extract_strided_slice %169 {offsets = [0, 256], sizes = [8, 128], strides = [1, 1]} : vector<8x384xf32> to vector<8x128xf32>
    %202 = arith.mulf %184, %201 : vector<8x128xf32>
    %203 = arith.addf %200, %202 : vector<8x128xf32>
    %204 = math.tanh %203 : vector<8x128xf32>
    %cst_74 = arith.constant 1.000000e+00 : f32
    %205 = vector.broadcast %cst_74 : f32 to vector<8x128xf32>
    %206 = arith.subf %205, %199 : vector<8x128xf32>
    %207 = arith.mulf %206, %204 : vector<8x128xf32>
    %208 = arith.mulf %199, %158 : vector<8x128xf32>
    %209 = arith.addf %207, %208 : vector<8x128xf32>
    %210 = arith.index_cast %162 : i32 to index
    %c0_75 = arith.constant 0 : index
    %211 = vector.load %arg11[%210, %c0_75] : memref<64x128xf32, #tpu.memory_space<vmem>>, vector<8x128xf32>
    tpu.vector_store %arg11[%210, %c0_75], %209 {strides = array<i32>} : memref<64x128xf32, #tpu.memory_space<vmem>>, vector<8x128xf32>,
    %c4_i32 = arith.constant 4 : i32
    %c8_i32_76 = arith.constant 8 : i32
    %212 = arith.muli %c4_i32, %c8_i32_76 : i32
    %213 = tpu.assume_multiple %212, 8 : i32
    %214 = arith.index_cast %213 : i32 to index
    %c0_77 = arith.constant 0 : index
    %215 = vector.load %arg10[%214, %c0_77] : memref<64x384xf32, #tpu.memory_space<vmem>>, vector<8x384xf32>
    %c0_78 = arith.constant 0 : index
    %c0_79 = arith.constant 0 : index
    %216 = vector.load %arg3[%c0_78, %c0_79] : memref<128x384xf32, #tpu.memory_space<vmem>>, vector<128x384xf32>
    %cst_80 = arith.constant dense<0.000000e+00> : vector<8x384xf32>
    %217 = tpu.matmul %209, %216, %cst_80 {dimension_numbers = #tpu.dot_dimension_numbers<[1], [0], [0], [1], [0, 0, 1, 1], [], []>} : vector<8x128xf32>, vector<128x384xf32>, vector<8x384xf32> -> vector<8x384xf32>
    %c0_81 = arith.constant 0 : index
    %c0_82 = arith.constant 0 : index
    %218 = vector.load %arg5[%c0_81, %c0_82] : memref<1x384xf32, #tpu.memory_space<vmem>>, vector<1x384xf32>
    %219 = vector.broadcast %218 : vector<1x384xf32> to vector<8x384xf32>
    %220 = arith.addf %217, %219 : vector<8x384xf32>
    %221 = vector.extract_strided_slice %215 {offsets = [0, 0], sizes = [8, 128], strides = [1, 1]} : vector<8x384xf32> to vector<8x128xf32>
    %222 = vector.extract_strided_slice %220 {offsets = [0, 0], sizes = [8, 128], strides = [1, 1]} : vector<8x384xf32> to vector<8x128xf32>
    %223 = arith.addf %221, %222 : vector<8x128xf32>
    %cst_83 = arith.constant -3.000000e+01 : f32
    %224 = vector.broadcast %cst_83 : f32 to vector<8x128xf32>
    %225 = arith.maximumf %223, %224 : vector<8x128xf32>
    %cst_84 = arith.constant 0.000000e+00 : f32
    %226 = vector.broadcast %cst_84 : f32 to vector<8x128xf32>
    %227 = arith.subf %226, %225 : vector<8x128xf32>
    %228 = math.exp %227 : vector<8x128xf32>
    %cst_85 = arith.constant 1.000000e+00 : f32
    %229 = vector.broadcast %cst_85 : f32 to vector<8x128xf32>
    %230 = arith.addf %229, %228 : vector<8x128xf32>
    %231 = tpu.reciprocal %230 {approx = true} : vector<8x128xf32> -> vector<8x128xf32>
    %232 = arith.mulf %230, %231 : vector<8x128xf32>
    %cst_86 = arith.constant 2.000000e+00 : f32
    %233 = vector.broadcast %cst_86 : f32 to vector<8x128xf32>
    %234 = arith.subf %233, %232 : vector<8x128xf32>
    %235 = arith.mulf %231, %234 : vector<8x128xf32>
    %236 = vector.extract_strided_slice %215 {offsets = [0, 128], sizes = [8, 128], strides = [1, 1]} : vector<8x384xf32> to vector<8x128xf32>
    %237 = vector.extract_strided_slice %220 {offsets = [0, 128], sizes = [8, 128], strides = [1, 1]} : vector<8x384xf32> to vector<8x128xf32>
    %238 = arith.addf %236, %237 : vector<8x128xf32>
    %cst_87 = arith.constant -3.000000e+01 : f32
    %239 = vector.broadcast %cst_87 : f32 to vector<8x128xf32>
    %240 = arith.maximumf %238, %239 : vector<8x128xf32>
    %cst_88 = arith.constant 0.000000e+00 : f32
    %241 = vector.broadcast %cst_88 : f32 to vector<8x128xf32>
    %242 = arith.subf %241, %240 : vector<8x128xf32>
    %243 = math.exp %242 : vector<8x128xf32>
    %cst_89 = arith.constant 1.000000e+00 : f32
    %244 = vector.broadcast %cst_89 : f32 to vector<8x128xf32>
    %245 = arith.addf %244, %243 : vector<8x128xf32>
    %246 = tpu.reciprocal %245 {approx = true} : vector<8x128xf32> -> vector<8x128xf32>
    %247 = arith.mulf %245, %246 : vector<8x128xf32>
    %cst_90 = arith.constant 2.000000e+00 : f32
    %248 = vector.broadcast %cst_90 : f32 to vector<8x128xf32>
    %249 = arith.subf %248, %247 : vector<8x128xf32>
    %250 = arith.mulf %246, %249 : vector<8x128xf32>
    %251 = vector.extract_strided_slice %215 {offsets = [0, 256], sizes = [8, 128], strides = [1, 1]} : vector<8x384xf32> to vector<8x128xf32>
    %252 = vector.extract_strided_slice %220 {offsets = [0, 256], sizes = [8, 128], strides = [1, 1]} : vector<8x384xf32> to vector<8x128xf32>
    %253 = arith.mulf %235, %252 : vector<8x128xf32>
    %254 = arith.addf %251, %253 : vector<8x128xf32>
    %255 = math.tanh %254 : vector<8x128xf32>
    %cst_91 = arith.constant 1.000000e+00 : f32
    %256 = vector.broadcast %cst_91 : f32 to vector<8x128xf32>
    %257 = arith.subf %256, %250 : vector<8x128xf32>
    %258 = arith.mulf %257, %255 : vector<8x128xf32>
    %259 = arith.mulf %250, %209 : vector<8x128xf32>
    %260 = arith.addf %258, %259 : vector<8x128xf32>
    %261 = arith.index_cast %213 : i32 to index
    %c0_92 = arith.constant 0 : index
    %262 = vector.load %arg11[%261, %c0_92] : memref<64x128xf32, #tpu.memory_space<vmem>>, vector<8x128xf32>
    tpu.vector_store %arg11[%261, %c0_92], %260 {strides = array<i32>} : memref<64x128xf32, #tpu.memory_space<vmem>>, vector<8x128xf32>,
    %c5_i32 = arith.constant 5 : i32
    %c8_i32_93 = arith.constant 8 : i32
    %263 = arith.muli %c5_i32, %c8_i32_93 : i32
    %264 = tpu.assume_multiple %263, 8 : i32
    %265 = arith.index_cast %264 : i32 to index
    %c0_94 = arith.constant 0 : index
    %266 = vector.load %arg10[%265, %c0_94] : memref<64x384xf32, #tpu.memory_space<vmem>>, vector<8x384xf32>
    %c0_95 = arith.constant 0 : index
    %c0_96 = arith.constant 0 : index
    %267 = vector.load %arg3[%c0_95, %c0_96] : memref<128x384xf32, #tpu.memory_space<vmem>>, vector<128x384xf32>
    %cst_97 = arith.constant dense<0.000000e+00> : vector<8x384xf32>
    %268 = tpu.matmul %260, %267, %cst_97 {dimension_numbers = #tpu.dot_dimension_numbers<[1], [0], [0], [1], [0, 0, 1, 1], [], []>} : vector<8x128xf32>, vector<128x384xf32>, vector<8x384xf32> -> vector<8x384xf32>
    %c0_98 = arith.constant 0 : index
    %c0_99 = arith.constant 0 : index
    %269 = vector.load %arg5[%c0_98, %c0_99] : memref<1x384xf32, #tpu.memory_space<vmem>>, vector<1x384xf32>
    %270 = vector.broadcast %269 : vector<1x384xf32> to vector<8x384xf32>
    %271 = arith.addf %268, %270 : vector<8x384xf32>
    %272 = vector.extract_strided_slice %266 {offsets = [0, 0], sizes = [8, 128], strides = [1, 1]} : vector<8x384xf32> to vector<8x128xf32>
    %273 = vector.extract_strided_slice %271 {offsets = [0, 0], sizes = [8, 128], strides = [1, 1]} : vector<8x384xf32> to vector<8x128xf32>
    %274 = arith.addf %272, %273 : vector<8x128xf32>
    %cst_100 = arith.constant -3.000000e+01 : f32
    %275 = vector.broadcast %cst_100 : f32 to vector<8x128xf32>
    %276 = arith.maximumf %274, %275 : vector<8x128xf32>
    %cst_101 = arith.constant 0.000000e+00 : f32
    %277 = vector.broadcast %cst_101 : f32 to vector<8x128xf32>
    %278 = arith.subf %277, %276 : vector<8x128xf32>
    %279 = math.exp %278 : vector<8x128xf32>
    %cst_102 = arith.constant 1.000000e+00 : f32
    %280 = vector.broadcast %cst_102 : f32 to vector<8x128xf32>
    %281 = arith.addf %280, %279 : vector<8x128xf32>
    %282 = tpu.reciprocal %281 {approx = true} : vector<8x128xf32> -> vector<8x128xf32>
    %283 = arith.mulf %281, %282 : vector<8x128xf32>
    %cst_103 = arith.constant 2.000000e+00 : f32
    %284 = vector.broadcast %cst_103 : f32 to vector<8x128xf32>
    %285 = arith.subf %284, %283 : vector<8x128xf32>
    %286 = arith.mulf %282, %285 : vector<8x128xf32>
    %287 = vector.extract_strided_slice %266 {offsets = [0, 128], sizes = [8, 128], strides = [1, 1]} : vector<8x384xf32> to vector<8x128xf32>
    %288 = vector.extract_strided_slice %271 {offsets = [0, 128], sizes = [8, 128], strides = [1, 1]} : vector<8x384xf32> to vector<8x128xf32>
    %289 = arith.addf %287, %288 : vector<8x128xf32>
    %cst_104 = arith.constant -3.000000e+01 : f32
    %290 = vector.broadcast %cst_104 : f32 to vector<8x128xf32>
    %291 = arith.maximumf %289, %290 : vector<8x128xf32>
    %cst_105 = arith.constant 0.000000e+00 : f32
    %292 = vector.broadcast %cst_105 : f32 to vector<8x128xf32>
    %293 = arith.subf %292, %291 : vector<8x128xf32>
    %294 = math.exp %293 : vector<8x128xf32>
    %cst_106 = arith.constant 1.000000e+00 : f32
    %295 = vector.broadcast %cst_106 : f32 to vector<8x128xf32>
    %296 = arith.addf %295, %294 : vector<8x128xf32>
    %297 = tpu.reciprocal %296 {approx = true} : vector<8x128xf32> -> vector<8x128xf32>
    %298 = arith.mulf %296, %297 : vector<8x128xf32>
    %cst_107 = arith.constant 2.000000e+00 : f32
    %299 = vector.broadcast %cst_107 : f32 to vector<8x128xf32>
    %300 = arith.subf %299, %298 : vector<8x128xf32>
    %301 = arith.mulf %297, %300 : vector<8x128xf32>
    %302 = vector.extract_strided_slice %266 {offsets = [0, 256], sizes = [8, 128], strides = [1, 1]} : vector<8x384xf32> to vector<8x128xf32>
    %303 = vector.extract_strided_slice %271 {offsets = [0, 256], sizes = [8, 128], strides = [1, 1]} : vector<8x384xf32> to vector<8x128xf32>
    %304 = arith.mulf %286, %303 : vector<8x128xf32>
    %305 = arith.addf %302, %304 : vector<8x128xf32>
    %306 = math.tanh %305 : vector<8x128xf32>
    %cst_108 = arith.constant 1.000000e+00 : f32
    %307 = vector.broadcast %cst_108 : f32 to vector<8x128xf32>
    %308 = arith.subf %307, %301 : vector<8x128xf32>
    %309 = arith.mulf %308, %306 : vector<8x128xf32>
    %310 = arith.mulf %301, %260 : vector<8x128xf32>
    %311 = arith.addf %309, %310 : vector<8x128xf32>
    %312 = arith.index_cast %264 : i32 to index
    %c0_109 = arith.constant 0 : index
    %313 = vector.load %arg11[%312, %c0_109] : memref<64x128xf32, #tpu.memory_space<vmem>>, vector<8x128xf32>
    tpu.vector_store %arg11[%312, %c0_109], %311 {strides = array<i32>} : memref<64x128xf32, #tpu.memory_space<vmem>>, vector<8x128xf32>,
    %c6_i32 = arith.constant 6 : i32
    %c8_i32_110 = arith.constant 8 : i32
    %314 = arith.muli %c6_i32, %c8_i32_110 : i32
    %315 = tpu.assume_multiple %314, 8 : i32
    %316 = arith.index_cast %315 : i32 to index
    %c0_111 = arith.constant 0 : index
    %317 = vector.load %arg10[%316, %c0_111] : memref<64x384xf32, #tpu.memory_space<vmem>>, vector<8x384xf32>
    %c0_112 = arith.constant 0 : index
    %c0_113 = arith.constant 0 : index
    %318 = vector.load %arg3[%c0_112, %c0_113] : memref<128x384xf32, #tpu.memory_space<vmem>>, vector<128x384xf32>
    %cst_114 = arith.constant dense<0.000000e+00> : vector<8x384xf32>
    %319 = tpu.matmul %311, %318, %cst_114 {dimension_numbers = #tpu.dot_dimension_numbers<[1], [0], [0], [1], [0, 0, 1, 1], [], []>} : vector<8x128xf32>, vector<128x384xf32>, vector<8x384xf32> -> vector<8x384xf32>
    %c0_115 = arith.constant 0 : index
    %c0_116 = arith.constant 0 : index
    %320 = vector.load %arg5[%c0_115, %c0_116] : memref<1x384xf32, #tpu.memory_space<vmem>>, vector<1x384xf32>
    %321 = vector.broadcast %320 : vector<1x384xf32> to vector<8x384xf32>
    %322 = arith.addf %319, %321 : vector<8x384xf32>
    %323 = vector.extract_strided_slice %317 {offsets = [0, 0], sizes = [8, 128], strides = [1, 1]} : vector<8x384xf32> to vector<8x128xf32>
    %324 = vector.extract_strided_slice %322 {offsets = [0, 0], sizes = [8, 128], strides = [1, 1]} : vector<8x384xf32> to vector<8x128xf32>
    %325 = arith.addf %323, %324 : vector<8x128xf32>
    %cst_117 = arith.constant -3.000000e+01 : f32
    %326 = vector.broadcast %cst_117 : f32 to vector<8x128xf32>
    %327 = arith.maximumf %325, %326 : vector<8x128xf32>
    %cst_118 = arith.constant 0.000000e+00 : f32
    %328 = vector.broadcast %cst_118 : f32 to vector<8x128xf32>
    %329 = arith.subf %328, %327 : vector<8x128xf32>
    %330 = math.exp %329 : vector<8x128xf32>
    %cst_119 = arith.constant 1.000000e+00 : f32
    %331 = vector.broadcast %cst_119 : f32 to vector<8x128xf32>
    %332 = arith.addf %331, %330 : vector<8x128xf32>
    %333 = tpu.reciprocal %332 {approx = true} : vector<8x128xf32> -> vector<8x128xf32>
    %334 = arith.mulf %332, %333 : vector<8x128xf32>
    %cst_120 = arith.constant 2.000000e+00 : f32
    %335 = vector.broadcast %cst_120 : f32 to vector<8x128xf32>
    %336 = arith.subf %335, %334 : vector<8x128xf32>
    %337 = arith.mulf %333, %336 : vector<8x128xf32>
    %338 = vector.extract_strided_slice %317 {offsets = [0, 128], sizes = [8, 128], strides = [1, 1]} : vector<8x384xf32> to vector<8x128xf32>
    %339 = vector.extract_strided_slice %322 {offsets = [0, 128], sizes = [8, 128], strides = [1, 1]} : vector<8x384xf32> to vector<8x128xf32>
    %340 = arith.addf %338, %339 : vector<8x128xf32>
    %cst_121 = arith.constant -3.000000e+01 : f32
    %341 = vector.broadcast %cst_121 : f32 to vector<8x128xf32>
    %342 = arith.maximumf %340, %341 : vector<8x128xf32>
    %cst_122 = arith.constant 0.000000e+00 : f32
    %343 = vector.broadcast %cst_122 : f32 to vector<8x128xf32>
    %344 = arith.subf %343, %342 : vector<8x128xf32>
    %345 = math.exp %344 : vector<8x128xf32>
    %cst_123 = arith.constant 1.000000e+00 : f32
    %346 = vector.broadcast %cst_123 : f32 to vector<8x128xf32>
    %347 = arith.addf %346, %345 : vector<8x128xf32>
    %348 = tpu.reciprocal %347 {approx = true} : vector<8x128xf32> -> vector<8x128xf32>
    %349 = arith.mulf %347, %348 : vector<8x128xf32>
    %cst_124 = arith.constant 2.000000e+00 : f32
    %350 = vector.broadcast %cst_124 : f32 to vector<8x128xf32>
    %351 = arith.subf %350, %349 : vector<8x128xf32>
    %352 = arith.mulf %348, %351 : vector<8x128xf32>
    %353 = vector.extract_strided_slice %317 {offsets = [0, 256], sizes = [8, 128], strides = [1, 1]} : vector<8x384xf32> to vector<8x128xf32>
    %354 = vector.extract_strided_slice %322 {offsets = [0, 256], sizes = [8, 128], strides = [1, 1]} : vector<8x384xf32> to vector<8x128xf32>
    %355 = arith.mulf %337, %354 : vector<8x128xf32>
    %356 = arith.addf %353, %355 : vector<8x128xf32>
    %357 = math.tanh %356 : vector<8x128xf32>
    %cst_125 = arith.constant 1.000000e+00 : f32
    %358 = vector.broadcast %cst_125 : f32 to vector<8x128xf32>
    %359 = arith.subf %358, %352 : vector<8x128xf32>
    %360 = arith.mulf %359, %357 : vector<8x128xf32>
    %361 = arith.mulf %352, %311 : vector<8x128xf32>
    %362 = arith.addf %360, %361 : vector<8x128xf32>
    %363 = arith.index_cast %315 : i32 to index
    %c0_126 = arith.constant 0 : index
    %364 = vector.load %arg11[%363, %c0_126] : memref<64x128xf32, #tpu.memory_space<vmem>>, vector<8x128xf32>
    tpu.vector_store %arg11[%363, %c0_126], %362 {strides = array<i32>} : memref<64x128xf32, #tpu.memory_space<vmem>>, vector<8x128xf32>,
    %c7_i32 = arith.constant 7 : i32
    %c8_i32_127 = arith.constant 8 : i32
    %365 = arith.muli %c7_i32, %c8_i32_127 : i32
    %366 = tpu.assume_multiple %365, 8 : i32
    %367 = arith.index_cast %366 : i32 to index
    %c0_128 = arith.constant 0 : index
    %368 = vector.load %arg10[%367, %c0_128] : memref<64x384xf32, #tpu.memory_space<vmem>>, vector<8x384xf32>
    %c0_129 = arith.constant 0 : index
    %c0_130 = arith.constant 0 : index
    %369 = vector.load %arg3[%c0_129, %c0_130] : memref<128x384xf32, #tpu.memory_space<vmem>>, vector<128x384xf32>
    %cst_131 = arith.constant dense<0.000000e+00> : vector<8x384xf32>
    %370 = tpu.matmul %362, %369, %cst_131 {dimension_numbers = #tpu.dot_dimension_numbers<[1], [0], [0], [1], [0, 0, 1, 1], [], []>} : vector<8x128xf32>, vector<128x384xf32>, vector<8x384xf32> -> vector<8x384xf32>
    %c0_132 = arith.constant 0 : index
    %c0_133 = arith.constant 0 : index
    %371 = vector.load %arg5[%c0_132, %c0_133] : memref<1x384xf32, #tpu.memory_space<vmem>>, vector<1x384xf32>
    %372 = vector.broadcast %371 : vector<1x384xf32> to vector<8x384xf32>
    %373 = arith.addf %370, %372 : vector<8x384xf32>
    %374 = vector.extract_strided_slice %368 {offsets = [0, 0], sizes = [8, 128], strides = [1, 1]} : vector<8x384xf32> to vector<8x128xf32>
    %375 = vector.extract_strided_slice %373 {offsets = [0, 0], sizes = [8, 128], strides = [1, 1]} : vector<8x384xf32> to vector<8x128xf32>
    %376 = arith.addf %374, %375 : vector<8x128xf32>
    %cst_134 = arith.constant -3.000000e+01 : f32
    %377 = vector.broadcast %cst_134 : f32 to vector<8x128xf32>
    %378 = arith.maximumf %376, %377 : vector<8x128xf32>
    %cst_135 = arith.constant 0.000000e+00 : f32
    %379 = vector.broadcast %cst_135 : f32 to vector<8x128xf32>
    %380 = arith.subf %379, %378 : vector<8x128xf32>
    %381 = math.exp %380 : vector<8x128xf32>
    %cst_136 = arith.constant 1.000000e+00 : f32
    %382 = vector.broadcast %cst_136 : f32 to vector<8x128xf32>
    %383 = arith.addf %382, %381 : vector<8x128xf32>
    %384 = tpu.reciprocal %383 {approx = true} : vector<8x128xf32> -> vector<8x128xf32>
    %385 = arith.mulf %383, %384 : vector<8x128xf32>
    %cst_137 = arith.constant 2.000000e+00 : f32
    %386 = vector.broadcast %cst_137 : f32 to vector<8x128xf32>
    %387 = arith.subf %386, %385 : vector<8x128xf32>
    %388 = arith.mulf %384, %387 : vector<8x128xf32>
    %389 = vector.extract_strided_slice %368 {offsets = [0, 128], sizes = [8, 128], strides = [1, 1]} : vector<8x384xf32> to vector<8x128xf32>
    %390 = vector.extract_strided_slice %373 {offsets = [0, 128], sizes = [8, 128], strides = [1, 1]} : vector<8x384xf32> to vector<8x128xf32>
    %391 = arith.addf %389, %390 : vector<8x128xf32>
    %cst_138 = arith.constant -3.000000e+01 : f32
    %392 = vector.broadcast %cst_138 : f32 to vector<8x128xf32>
    %393 = arith.maximumf %391, %392 : vector<8x128xf32>
    %cst_139 = arith.constant 0.000000e+00 : f32
    %394 = vector.broadcast %cst_139 : f32 to vector<8x128xf32>
    %395 = arith.subf %394, %393 : vector<8x128xf32>
    %396 = math.exp %395 : vector<8x128xf32>
    %cst_140 = arith.constant 1.000000e+00 : f32
    %397 = vector.broadcast %cst_140 : f32 to vector<8x128xf32>
    %398 = arith.addf %397, %396 : vector<8x128xf32>
    %399 = tpu.reciprocal %398 {approx = true} : vector<8x128xf32> -> vector<8x128xf32>
    %400 = arith.mulf %398, %399 : vector<8x128xf32>
    %cst_141 = arith.constant 2.000000e+00 : f32
    %401 = vector.broadcast %cst_141 : f32 to vector<8x128xf32>
    %402 = arith.subf %401, %400 : vector<8x128xf32>
    %403 = arith.mulf %399, %402 : vector<8x128xf32>
    %404 = vector.extract_strided_slice %368 {offsets = [0, 256], sizes = [8, 128], strides = [1, 1]} : vector<8x384xf32> to vector<8x128xf32>
    %405 = vector.extract_strided_slice %373 {offsets = [0, 256], sizes = [8, 128], strides = [1, 1]} : vector<8x384xf32> to vector<8x128xf32>
    %406 = arith.mulf %388, %405 : vector<8x128xf32>
    %407 = arith.addf %404, %406 : vector<8x128xf32>
    %408 = math.tanh %407 : vector<8x128xf32>
    %cst_142 = arith.constant 1.000000e+00 : f32
    %409 = vector.broadcast %cst_142 : f32 to vector<8x128xf32>
    %410 = arith.subf %409, %403 : vector<8x128xf32>
    %411 = arith.mulf %410, %408 : vector<8x128xf32>
    %412 = arith.mulf %403, %362 : vector<8x128xf32>
    %413 = arith.addf %411, %412 : vector<8x128xf32>
    %414 = arith.index_cast %366 : i32 to index
    %c0_143 = arith.constant 0 : index
    %415 = vector.load %arg11[%414, %c0_143] : memref<64x128xf32, #tpu.memory_space<vmem>>, vector<8x128xf32>
    tpu.vector_store %arg11[%414, %c0_143], %413 {strides = array<i32>} : memref<64x128xf32, #tpu.memory_space<vmem>>, vector<8x128xf32>,
    %c8_i32_144 = arith.constant 8 : i32
    %c0_145 = arith.constant 0 : index
    %c0_146 = arith.constant 0 : index
    %416 = vector.load %arg9[%c0_145, %c0_146] : memref<8x128xf32, #tpu.memory_space<vmem>>, vector<8x128xf32>
    tpu.vector_store %arg9[%c0_145, %c0_146], %413 {strides = array<i32>} : memref<8x128xf32, #tpu.memory_space<vmem>>, vector<8x128xf32>,
    %c0_147 = arith.constant 0 : index
    %c0_148 = arith.constant 0 : index
    %417 = vector.load %arg11[%c0_147, %c0_148] : memref<64x128xf32, #tpu.memory_space<vmem>>, vector<64x128xf32>
    %c0_149 = arith.constant 0 : index
    %c0_150 = arith.constant 0 : index
    %418 = vector.load %arg6[%c0_149, %c0_150] : memref<128x128xf32, #tpu.memory_space<vmem>>, vector<128x128xf32>
    %cst_151 = arith.constant dense<0.000000e+00> : vector<64x128xf32>
    %419 = tpu.matmul %417, %418, %cst_151 {dimension_numbers = #tpu.dot_dimension_numbers<[1], [0], [0], [1], [0, 0, 1, 1], [], []>} : vector<64x128xf32>, vector<128x128xf32>, vector<64x128xf32> -> vector<64x128xf32>
    %c0_152 = arith.constant 0 : index
    %c0_153 = arith.constant 0 : index
    %420 = vector.load %arg7[%c0_152, %c0_153] : memref<1x128xf32, #tpu.memory_space<vmem>>, vector<1x128xf32>
    %421 = vector.broadcast %420 : vector<1x128xf32> to vector<64x128xf32>
    %422 = arith.addf %419, %421 : vector<64x128xf32>
    %c0_154 = arith.constant 0 : index
    %c0_155 = arith.constant 0 : index
    %423 = vector.load %arg8[%c0_154, %c0_155] : memref<64x128xf32, #tpu.memory_space<vmem>>, vector<64x128xf32>
    tpu.vector_store %arg8[%c0_154, %c0_155], %422 {strides = array<i32>} : memref<64x128xf32, #tpu.memory_space<vmem>>, vector<64x128xf32>,
    return
  }
}

</mosaic_0001>

<bundles_post_ra>
// kernel: encoder_rnn_forward.1
= control target key start
LH: loop header
LB: loop body
LE: loop exit
PB: predicated region body
PF: predicated region fallthrough
CT: control target
= control target key end

     0   :  { %vm62_vm0 = vcmask 130048   ;;  %v4560_v3 = vmov 0.0   ;;  %vm3027_vm1 = vmmov 0   ;;  %s4550_s2 = inlined_call_operand.vmem [shape: f32[16,384], index: 2, kind: input, shape index: {}]   ;;  %s4551_s0 = inlined_call_operand.vmem [shape: f32[64,16], index: 0, kind: input, shape index: {}]   ;;  %s4552_s3 = inlined_call_operand.vmem [shape: f32[128,384], index: 3, kind: input, shape index: {}]   ;;  %s4553_s1 = inlined_call_operand.vmem [shape: f32[8,128], index: 1, kind: input, shape index: {}]   ;;  %s4554_s4 = inlined_call_operand.vmem [shape: f32[1,384], index: 4, kind: input, shape index: {}]   ;;  %s4555_s5 = inlined_call_operand.vmem [shape: f32[1,384], index: 5, kind: input, shape index: {}]   ;;  %s4556_s6 = inlined_call_operand.vmem [shape: f32[128,128], index: 6, kind: input, shape index: {}]   ;;  %s4557_s7 = inlined_call_operand.vmem [shape: f32[1,128], index: 7, kind: input, shape index: {}]   ;;  %s4558_s8 = inlined_call_operand.vmem [shape: f32[64,128], index: 8, kind: output, shape index: {0}]   ;;  %s4559_s9 = inlined_call_operand.vmem [shape: f32[8,128], index: 9, kind: output, shape index: {1}]  }
   0x1   :  { %v44_v0 = vld [vmem:[%s4550_s2 + $0x28] sm:$0xff]  ;;  %v41_v1 = vld [vmem:[%s4550_s2 + $0x10] sm:$0xff]  ;;  %v3087_v2 = vld [vmem:[%s4551_s0] sm:$0xff]  ;;  %151 = vmatprep.mubr.f32.mxu0 %v4560_v3 }
   0x2   :  { %2604 = vmatprep.subr.mxu1 %v44_v0  ;;  %2608 = vmatprep.mubr.msk.f32.mxu1 %vm62_vm0, %v3087_v2  ;;  %v3095_v4 = vld [vmem:[%s4551_s0 + $0x8] sm:$0xff]  ;;  %v3100_v5 = vld [vmem:[%s4552_s3 + $0x170] sm:$0xff]  ;;  %v3110_v7 = vld [vmem:[%s4552_s3 + $0x158] sm:$0xff] }
   0x3   :  { %2605 = vmatpush3.msra.mxu1 %v44_v0  ;;  %v3105_v6 = vld [vmem:[%s4552_s3 + $0x168] sm:$0xff]  ;;  %v3118_v8 = vld [vmem:[%s4552_s3 + $0x150] sm:$0xff]  ;;  %v3124_v9 = vld [vmem:[%s4552_s3 + $0x140] sm:$0xff]  ;;  %v47_v0 = vlaneseq }
   0x4   :  { %2606 = vmatprep.subr.mxu1 %v41_v1  ;;  %v3130_v10 = vld [vmem:[%s4552_s3 + $0x138] sm:$0xff]  ;;  %v3135_v11 = vld [vmem:[%s4551_s0 + $0x10] sm:$0xff]  ;;  %v3146_v13 = vld [vmem:[%s4552_s3 + $0x128] sm:$0xff] }
   0x5   :  { %2607 = vmatpush3.msra.mxu1 %v41_v1  ;;  %v3140_v12 = vld [vmem:[%s4551_s0 + $0x18] sm:$0xff]  ;;  %v3154_v14 = vld [vmem:[%s4552_s3 + $0x120] sm:$0xff]  ;;  %v3167_v16 = vld [vmem:[%s4552_s3 + $0x110] sm:$0xff]  ;;  %v48_v1 = vshrl.u32 %v47_v0, 7 }
   0x6   :  { %2609 = vmatmul.mubr.msk.f32.vlgmr.msra.gmra.mxu1 %vm62_vm0, %v3095_v4  ;;  %401 = vmatprep.subr.mxu1 %v3100_v5  ;;  %v3161_v15 = vld [vmem:[%s4551_s0 + $0x20] sm:$0xff]  ;;  %v3174_v17 = vld [vmem:[%s4551_s0 + $0x28] sm:$0xff]  ;;  %v3185_v19 = vld [vmem:[%s4551_s0 + $0x30] sm:$0xff] }
   0x7   :  { %402 = vmatpush1.msra.mxu1 %v3105_v6  ;;  %2611 = vmatprep.mubr.msk.f32.mxu1 %vm62_vm0, %v3135_v11  ;;  %v3180_v18 = vld [vmem:[%s4552_s3 + $0x108] sm:$0xff]  ;;  %v43_v20 = vld [vmem:[%s4550_s2 + $0x20] sm:$0xff]  ;;  %v3194_v21 = vld [vmem:[%s4552_s3 + $0xf8] sm:$0xff] }
   0x8   :  { %403 = vmatprep.subr.mxu1 %v3110_v7  ;;  %115 = vmatprep.subr.mxu0 %v43_v20  ;;  %v42_v22 = vld [vmem:[%s4550_s2 + $0x18] sm:$0xff]  ;;  %v3203_v23 = vld [vmem:[%s4552_s3 + $0xf0] sm:$0xff]  ;;  %v40_v24 = vld [vmem:[%s4550_s2 + $0x8] sm:$0xff] }
   0x9   :  { %404 = vmatpush1.msra.mxu1 %v3118_v8  ;;  %v3214_v25 = vld [vmem:[%s4552_s3 + $0xe0] sm:$0xff]  ;;  %v3221_v26 = vld [vmem:[%s4551_s0 + $0x38] sm:$0xff]  ;;  %116 = vmatpush1.msra.mxu0 %v42_v22  ;;  %v3236_v29 = vld [vmem:[%s4552_s3 + $0xc8] sm:$0xff] }
   0xa   :  { %405 = vmatprep.subr.mxu1 %v3124_v9  ;;  %2612 = vmatmul.mubr.msk.f32.gmra.mxu1 %vm62_vm0, %v3140_v12  ;;  %v3227_v27 = vld [vmem:[%s4552_s3 + $0xd8] sm:$0xff]  ;;  %v39_v28 = vld [vmem:[%s4550_s2] sm:$0xff]  ;;  %v3250_v31 = vld [vmem:[%s4552_s3 + $0xb0] sm:$0xff] }
   0xb   :  { %406 = vmatpush1.msra.mxu1 %v3130_v10  ;;  %2614 = vmatprep.mubr.msk.f32.mxu1 %vm62_vm0, %v3161_v15  ;;  %v3242_v30 = vld [vmem:[%s4552_s3 + $0xc0] sm:$0xff]  ;;  %v3256_v32 = vld [vmem:[%s4552_s3 + $0xa8] sm:$0xff]  ;;  %v3264_v33 = vld [vmem:[%s4552_s3 + $0x98] sm:$0xff] }
   0xc   :  { %407 = vmatprep.subr.mxu1 %v3146_v13  ;;  %117 = vmatprep.subr.mxu0 %v40_v24  ;;  %v3271_v34 = vld [vmem:[%s4552_s3 + $0x90] sm:$0xff]  ;;  %v3278_v35 = vld [vmem:[%s4552_s3 + $0x80] sm:$0xff]  ;;  %v3285_v36 = vld [vmem:[%s4552_s3 + $0x78] sm:$0xff] }
   0xd   :  { %408 = vmatpush1.msra.mxu1 %v3154_v14  ;;  %118 = vmatpush1.msra.mxu0 %v39_v28  ;;  %v3292_v37 = vld [vmem:[%s4552_s3 + $0x68] sm:$0xff]  ;;  %v3299_v38 = vld [vmem:[%s4552_s3 + $0x60] sm:$0xff]  ;;  %v3307_v39 = vld [vmem:[%s4552_s3 + $0x50] sm:$0xff] }
   0xe   :  { %409 = vmatprep.subr.mxu1 %v3167_v16  ;;  %2615 = vmatmul.mubr.msk.f32.gmra.mxu1 %vm62_vm0, %v3174_v17  ;;  %v3314_v40 = vld [vmem:[%s4552_s3 + $0x48] sm:$0xff]  ;;  %v3321_v41 = vld [vmem:[%s4552_s3 + $0x38] sm:$0xff]  ;;  %v3328_v42 = vld [vmem:[%s4552_s3 + $0x30] sm:$0xff] }
   0xf   :  { %410 = vmatpush1.msra.mxu1 %v3180_v18  ;;  %2617 = vmatprep.mubr.msk.f32.mxu1 %vm62_vm0, %v3185_v19  ;;  %4599 = vst [vmem:[#allocation4_spill] sm:$0xff] %v3321_v41  ;;  %4600 = vst [vmem:[#allocation5_spill] sm:$0xff] %v3328_v42  ;;  %v3335_v43 = vld [vmem:[%s4552_s3 + $0x20] sm:$0xff]  ;;  %v3342_v44 = vld [vmem:[%s4552_s3 + $0x18] sm:$0xff] }
  0x10   :  { %411 = vmatprep.subr.mxu1 %v3194_v21  ;;  %2417 = vmatmul.mubr.msk.f32.vlgmr.msra.gmra.mxu0 %vm62_vm0, %v3087_v2  ;;  %4601 = vst [vmem:[#allocation6_spill] sm:$0xff] %v3335_v43  ;;  %4602 = vst [vmem:[#allocation7_spill] sm:$0xff] %v3342_v44  ;;  %v3350_v45 = vld [vmem:[%s4552_s3 + $0x8] sm:$0xff]  ;;  %v3357_v46 = vld [vmem:[%s4552_s3] sm:$0xff]  ;;  %v3559_v2 = vsub.s32 2, %v48_v1 }
  0x11   :  { %412 = vmatpush1.msra.mxu1 %v3203_v23  ;;  %641 = vmatprep.subr.mxu0 %v3100_v5  ;;  %4603 = vst [vmem:[#allocation8_spill] sm:$0xff] %v3350_v45  ;;  %4604 = vst [vmem:[#allocation9_spill] sm:$0xff] %v3357_v46  ;;  %v3364_v47 = vld [vmem:[%s4553_s1] sm:$0xff]  ;;  %v3371_v48 = vld [vmem:[%s4552_s3 + $0x178] sm:$0xff] }
  0x12   :  { %413 = vmatprep.subr.mxu1 %v3214_v25  ;;  %2618 = vmatmul.mubr.msk.f32.gmra.mxu1 %vm62_vm0, %v3221_v26  ;;  %v3381_v49 = vld [vmem:[%s4552_s3 + $0x160] sm:$0xff]  ;;  %v3390_v50 = vld [vmem:[%s4552_s3 + $0x148] sm:$0xff]  ;;  %v3400_v51 = vld [vmem:[%s4552_s3 + $0x130] sm:$0xff] }
  0x13   :  { %414 = vmatpush1.msra.mxu1 %v3227_v27  ;;  %465 = vmatprep.mubr.f32.mxu1 %v4560_v3  ;;  %v3409_v52 = vld [vmem:[%s4552_s3 + $0x118] sm:$0xff]  ;;  %v3418_v53 = vld [vmem:[%s4552_s3 + $0x100] sm:$0xff]  ;;  %v3428_v54 = vld [vmem:[%s4552_s3 + $0xe8] sm:$0xff] }
  0x14   :  { %415 = vmatprep.subr.mxu1 %v3236_v29  ;;  %642 = vmatpush1.msra.mxu0 %v3105_v6  ;;  %v3437_v55 = vld [vmem:[%s4552_s3 + $0xd0] sm:$0xff]  ;;  %v3446_v56 = vld [vmem:[%s4552_s3 + $0xb8] sm:$0xff]  ;;  %v3456_v57 = vld [vmem:[%s4552_s3 + $0xa0] sm:$0xff] }
  0x15   :  { %416 = vmatpush1.msra.mxu1 %v3242_v30  ;;  %157 = vmatprep.mubr.f32.mxu0 %v4560_v3  ;;  %v3465_v58 = vld [vmem:[%s4552_s3 + $0x88] sm:$0xff]  ;;  %v3474_v59 = vld [vmem:[%s4552_s3 + $0x70] sm:$0xff]  ;;  %v3484_v60 = vld [vmem:[%s4552_s3 + $0x58] sm:$0xff] }
  0x16   :  { %417 = vmatprep.subr.mxu1 %v3250_v31  ;;  %643 = vmatprep.subr.mxu0 %v3110_v7  ;;  %4605 = vst [vmem:[#allocation10_spill] sm:$0xff] %v3484_v60  ;;  %v3493_v61 = vld [vmem:[%s4552_s3 + $0x40] sm:$0xff]  ;;  %v3502_v62 = vld [vmem:[%s4552_s3 + $0x28] sm:$0xff]  ;;  %v3512_v63 = vld [vmem:[%s4552_s3 + $0x10] sm:$0xff] }
  0x17   :  { %418 = vmatpush1.msra.mxu1 %v3256_v32  ;;  %2418 = vmatmul.mubr.msk.f32.gmra.mxu0 %vm62_vm0, %v3095_v4  ;;  %4606 = vst [vmem:[#allocation11_spill] sm:$0xff] %v3493_v61  ;;  %4607 = vst [vmem:[#allocation12_spill] sm:$0xff] %v3502_v62  ;;  %v45_v4 = vld [vmem:[%s4554_s4] sm:$0x7] }
  0x18   :  { %419 = vmatprep.subr.mxu1 %v3264_v33  ;;  %644 = vmatpush1.msra.mxu0 %v3118_v8  ;;  %4608 = vst [vmem:[#allocation13_spill] sm:$0xff] %v3512_v63 }
  0x19   :  { %420 = vmatpush1.msra.mxu1 %v3271_v34  ;;  %645 = vmatprep.subr.mxu0 %v3124_v9 }
  0x1a   :  { %421 = vmatprep.subr.mxu1 %v3278_v35  ;;  %646 = vmatpush1.msra.mxu0 %v3130_v10 }
  0x1b   :  { %422 = vmatpush1.msra.mxu1 %v3285_v36  ;;  %163 = vmatprep.mubr.f32.mxu0 %v4560_v3 }
  0x1c   :  { %423 = vmatprep.subr.mxu1 %v3292_v37  ;;  %647 = vmatprep.subr.mxu0 %v3146_v13 }
  0x1d   :  { %424 = vmatpush1.msra.mxu1 %v3299_v38  ;;  %2419 = vmatmul.mubr.msk.f32.gmra.mxu0 %vm62_vm0, %v3135_v11 }
  0x1e   :  { %425 = vmatprep.subr.mxu1 %v3307_v39  ;;  %648 = vmatpush1.msra.mxu0 %v3154_v14 }
  0x1f   :  { %426 = vmatpush1.msra.mxu1 %v3314_v40  ;;  %649 = vmatprep.subr.mxu0 %v3167_v16 }
  0x20   :  { %427 = vmatprep.subr.mxu1 %v3321_v41  ;;  %650 = vmatpush1.msra.mxu0 %v3180_v18 }
  0x21   :  { %428 = vmatpush1.msra.mxu1 %v3328_v42  ;;  %169 = vmatprep.mubr.f32.mxu0 %v4560_v3 }
  0x22   :  { %429 = vmatprep.subr.mxu1 %v3335_v43  ;;  %651 = vmatprep.subr.mxu0 %v3194_v21 }
  0x23   :  { %430 = vmatpush1.msra.mxu1 %v3342_v44  ;;  %2420 = vmatmul.mubr.msk.f32.gmra.mxu0 %vm62_vm0, %v3140_v12 }
  0x24   :  { %431 = vmatprep.subr.mxu1 %v3350_v45  ;;  %652 = vmatpush1.msra.mxu0 %v3203_v23 }
  0x25   :  { %432 = vmatpush1.msra.mxu1 %v3357_v46  ;;  %653 = vmatprep.subr.mxu0 %v3214_v25 }
  0x26   :  { %466 = vmatmul.mubr.f32.vlgmr.msra.gmra.mxu1 %v3364_v47  ;;  %2620 = vmatprep.subr.mxu1 %v4560_v3 }
  0x27   :  { %2621 = vmatpush3.msra.mxu1 %v3371_v48  ;;  %2652 = vmatprep.mubr.msk.f32.mxu1 %vm3027_vm1, %v4560_v3 }
  0x28   :  { %2622 = vmatprep.subr.mxu1 %v4560_v3  ;;  %654 = vmatpush1.msra.mxu0 %v3227_v27 }
  0x29   :  { %2623 = vmatpush3.msra.mxu1 %v3381_v49  ;;  %175 = vmatprep.mubr.f32.mxu0 %v4560_v3 }
  0x2a   :  { %2624 = vmatprep.subr.mxu1 %v4560_v3  ;;  %655 = vmatprep.subr.mxu0 %v3236_v29 }
  0x2b   :  { %2625 = vmatpush3.msra.mxu1 %v3390_v50  ;;  %2421 = vmatmul.mubr.msk.f32.gmra.mxu0 %vm62_vm0, %v3161_v15 }
  0x2c   :  { %2626 = vmatprep.subr.mxu1 %v4560_v3  ;;  %656 = vmatpush1.msra.mxu0 %v3242_v30 }
  0x2d   :  { %2627 = vmatpush3.msra.mxu1 %v3400_v51  ;;  %657 = vmatprep.subr.mxu0 %v3250_v31 }
  0x2e   :  { %2628 = vmatprep.subr.mxu1 %v4560_v3  ;;  %658 = vmatpush1.msra.mxu0 %v3256_v32 }
  0x2f   :  { %2629 = vmatpush3.msra.mxu1 %v3409_v52  ;;  %181 = vmatprep.mubr.f32.mxu0 %v4560_v3 }
  0x30   :  { %2630 = vmatprep.subr.mxu1 %v4560_v3  ;;  %659 = vmatprep.subr.mxu0 %v3264_v33 }
  0x31   :  { %2631 = vmatpush3.msra.mxu1 %v3418_v53  ;;  %2422 = vmatmul.mubr.msk.f32.gmra.mxu0 %vm62_vm0, %v3174_v17 }
  0x32   :  { %2632 = vmatprep.subr.mxu1 %v4560_v3  ;;  %660 = vmatpush1.msra.mxu0 %v3271_v34 }
  0x33   :  { %2633 = vmatpush3.msra.mxu1 %v3428_v54  ;;  %661 = vmatprep.subr.mxu0 %v3278_v35 }
  0x34   :  { %2634 = vmatprep.subr.mxu1 %v4560_v3  ;;  %662 = vmatpush1.msra.mxu0 %v3285_v36 }
  0x35   :  { %2635 = vmatpush3.msra.mxu1 %v3437_v55  ;;  %187 = vmatprep.mubr.f32.mxu0 %v4560_v3 }
  0x36   :  { %2636 = vmatprep.subr.mxu1 %v4560_v3  ;;  %663 = vmatprep.subr.mxu0 %v3292_v37 }
  0x37   :  { %2637 = vmatpush3.msra.mxu1 %v3446_v56  ;;  %2423 = vmatmul.mubr.msk.f32.gmra.mxu0 %vm62_vm0, %v3185_v19 }
  0x38   :  { %2638 = vmatprep.subr.mxu1 %v4560_v3  ;;  %664 = vmatpush1.msra.mxu0 %v3299_v38 }
  0x39   :  { %2639 = vmatpush3.msra.mxu1 %v3456_v57  ;;  %665 = vmatprep.subr.mxu0 %v3307_v39 }
  0x3a   :  { %2640 = vmatprep.subr.mxu1 %v4560_v3  ;;  %666 = vmatpush1.msra.mxu0 %v3314_v40 }
  0x3b   :  { %2641 = vmatpush3.msra.mxu1 %v3465_v58  ;;  %193 = vmatprep.mubr.f32.mxu0 %v4560_v3 }
  0x3c   :  { %2642 = vmatprep.subr.mxu1 %v4560_v3  ;;  %667 = vmatprep.subr.mxu0 %v3321_v41 }
  0x3d   :  { %2643 = vmatpush3.msra.mxu1 %v3474_v59  ;;  %2424 = vmatmul.mubr.msk.f32.gmra.mxu0 %vm62_vm0, %v3221_v26 }
  0x3e   :  { %2644 = vmatprep.subr.mxu1 %v4560_v3  ;;  %668 = vmatpush1.msra.mxu0 %v3328_v42 }
  0x3f   :  { %2645 = vmatpush3.msra.mxu1 %v3484_v60  ;;  %669 = vmatprep.subr.mxu0 %v3335_v43 }
  0x40   :  { %2646 = vmatprep.subr.mxu1 %v4560_v3  ;;  %670 = vmatpush1.msra.mxu0 %v3342_v44 }
  0x41   :  { %2647 = vmatpush3.msra.mxu1 %v3493_v61  ;;  %671 = vmatprep.subr.mxu0 %v3350_v45 }
  0x42   :  { %2648 = vmatprep.subr.mxu1 %v4560_v3  ;;  %672 = vmatpush1.msra.mxu0 %v3357_v46 }
  0x43   :  { %2649 = vmatpush3.msra.mxu1 %v3502_v62  ;;  %705 = vmatprep.mubr.f32.mxu0 %v4560_v3 }
  0x44   :  { %2650 = vmatprep.subr.mxu1 %v4560_v3  ;;  %882 = vmatprep.subr.mxu0 %v3100_v5  ;;  %v3565_v5 = vrot.slane %v45_v4, %v3559_v2 }
  0x45   :  { %2651 = vmatpush3.msra.mxu1 %v3512_v63 }
  0x46   :  { %2653 = vmatmul.mubr.f32.vlgmr.msra.gmra.mxu1 %v3364_v47  ;;  %2655 = vmatprep.subr.mxu1 %v4560_v3 }
  0x47   :  { %2656 = vmatpush3.msra.mxu1 %v3371_v48  ;;  %2687 = vmatprep.mubr.msk.f32.mxu1 %vm3027_vm1, %v4560_v3 }
  0x48   :  { %2657 = vmatprep.subr.mxu1 %v4560_v3 }
  0x49   :  { %2658 = vmatpush3.msra.mxu1 %v3381_v49 }
  0x4a   :  { %2659 = vmatprep.subr.mxu1 %v4560_v3 }
  0x4b   :  { %2660 = vmatpush3.msra.mxu1 %v3390_v50 }
  0x4c   :  { %2661 = vmatprep.subr.mxu1 %v4560_v3 }
  0x4d   :  { %2662 = vmatpush3.msra.mxu1 %v3400_v51 }
  0x4e   :  { %2663 = vmatprep.subr.mxu1 %v4560_v3 }
  0x4f   :  { %2664 = vmatpush3.msra.mxu1 %v3409_v52 }
  0x50   :  { %2665 = vmatprep.subr.mxu1 %v4560_v3 }
  0x51   :  { %2666 = vmatpush3.msra.mxu1 %v3418_v53 }
  0x52   :  { %2667 = vmatprep.subr.mxu1 %v4560_v3 }
  0x53   :  { %2668 = vmatpush3.msra.mxu1 %v3428_v54 }
  0x54   :  { %2669 = vmatprep.subr.mxu1 %v4560_v3 }
  0x55   :  { %2670 = vmatpush3.msra.mxu1 %v3437_v55 }
  0x56   :  { %2671 = vmatprep.subr.mxu1 %v4560_v3 }
  0x57   :  { %2672 = vmatpush3.msra.mxu1 %v3446_v56 }
  0x58   :  { %2673 = vmatprep.subr.mxu1 %v4560_v3 }
  0x59   :  { %2674 = vmatpush3.msra.mxu1 %v3456_v57 }
  0x5a   :  { %2675 = vmatprep.subr.mxu1 %v4560_v3 }
  0x5b   :  { %2676 = vmatpush3.msra.mxu1 %v3465_v58 }
  0x5c   :  { %2677 = vmatprep.subr.mxu1 %v4560_v3 }
  0x5d   :  { %2678 = vmatpush3.msra.mxu1 %v3474_v59 }
  0x5e   :  { %2679 = vmatprep.subr.mxu1 %v4560_v3 }
  0x5f   :  { %2680 = vmatpush3.msra.mxu1 %v3484_v60 }
  0x60   :  { %2681 = vmatprep.subr.mxu1 %v4560_v3 }
  0x61   :  { %2682 = vmatpush3.msra.mxu1 %v3493_v61 }
  0x62   :  { %2683 = vmatprep.subr.mxu1 %v4560_v3 }
  0x63   :  { %2684 = vmatpush3.msra.mxu1 %v3502_v62 }
  0x64   :  { %2685 = vmatprep.subr.mxu1 %v4560_v3 }
  0x65   :  { %2686 = vmatpush3.msra.mxu1 %v3512_v63 }
  0x66   :  { %2690 = vmatprep.subr.mxu1 %v4560_v3 }
  0xc6   :  { %v2610_v11 = vpop.f32.mrf.mxu1 }
  0xc7   :  { %v3568_v12 = vadd.f32 %v2610_v11, %v3565_v5 }
  0xc8   :  { %v3570_v15 = vpop.f32.mrf.mxu1 }
  0xc9   :  { %4609 = vst [vmem:[#allocation14_spill] sm:$0xff] %v3568_v12 }
  0xca   :  { %v2613_v17 = vpop.f32.mrf.mxu1 }
  0xcb   :  { %v3573_v19 = vadd.f32 %v2613_v17, %v3565_v5 }
  0xcc   :  { %v276_v20 = vpop.f32.mrf.mxu1 }
  0xcd   :  { %4610 = vst [vmem:[#allocation15_spill] sm:$0xff] %v3573_v19  ;;  %v3576_v22 = vadd.f32 %v276_v20, %v3565_v5 }
  0xce   :  { %v2616_v24 = vpop.f32.mrf.mxu1 }
  0xcf   :  { %4611 = vst [vmem:[#allocation16_spill] sm:$0xff] %v3576_v22  ;;  %v3579_v26 = vadd.f32 %v2616_v24, %v3565_v5  ;;  %v3592_v22 = vsub.s32 0, %v48_v1 }
  0xd0   :  { %v286_v28 = vpop.f32.mrf.mxu1  ;;  %v153_v63 = vpop.f32.mrf.mxu0 }
  0xd1   :  { %4612 = vst [vmem:[#allocation17_spill] sm:$0xff] %v3579_v26  ;;  %v3582_v0 = vadd.f32 %v286_v28, %v3565_v5  ;;  %4617 = vst [vmem:[#allocation22_spill] sm:$0xff] %v3592_v22  ;;  %v3596_v26 = vsub.s32 1, %v48_v1  ;;  %v3599_v28 = vrot.slane %v45_v4, %v3592_v22 }
  0xd2   :  { %v2619_v11 = vpop.f32.mrf.mxu1  ;;  %v155_v19 = vpop.f32.mrf.mxu0 }
  0xd3   :  { %4613 = vst [vmem:[#allocation18_spill] sm:$0xff] %v3582_v0  ;;  %v3585_v3 = vadd.f32 %v2619_v11, %v3565_v5  ;;  %4619 = vst [vmem:[#allocation24_spill] sm:$0xff] %v3596_v26  ;;  %v384_v11 = vld [vmem:[%s4555_s5] sm:$0x7] }
  0xd4   :  { %v296_v12 = vpop.f32.mrf.mxu1  ;;  %v393_v46 = vrot.slane %v384_v11, %v3596_v26 }
  0xd5   :  { %4614 = vst [vmem:[#allocation19_spill] sm:$0xff] %v3585_v3  ;;  %v3588_v17 = vadd.f32 %v296_v12, %v3565_v5  ;;  %v3605_v12 = vrot.slane %v45_v4, %v3596_v26 }
  0xd7   :  { %4615 = vst [vmem:[#allocation20_spill] sm:$0xff] %v3588_v17  ;;  %v3590_v20 = vpop.f32.mrf.mxu0  ;;  %4620 = vst [vmem:[#allocation25_spill] sm:$0xff] %v3605_v12  ;;  %v156_v4 = vadd.f32 %v155_v19, %v3605_v12 }
  0xd8   :  { %4616 = vst [vmem:[#allocation21_spill] sm:$0xff] %v3590_v20  ;;  %v389_v20 = vrot.slane %v384_v11, %v3592_v22 }
  0xd9   :  { %v3594_v24 = vpop.f32.mrf.mxu0 }
  0xda   :  { %4618 = vst [vmem:[#allocation23_spill] sm:$0xff] %v3594_v24  ;;  %v154_v24 = vadd.f32 %v153_v63, %v3599_v28 }
  0xdd   :  { %v165_v3 = vpop.f32.mrf.mxu0 }
  0xde   :  { %v3608_v17 = vadd.f32 %v165_v3, %v3599_v28 }
  0xdf   :  { %v167_v0 = vpop.f32.mrf.mxu0 }
  0xe0   :  { %4621 = vst [vmem:[#allocation26_spill] sm:$0xff] %v3608_v17  ;;  %v3612_v1 = vadd.f32 %v167_v0, %v3605_v12 }
  0xe2   :  { %4622 = vst [vmem:[#allocation27_spill] sm:$0xff] %v3612_v1 }
  0xe3   :  { %v171_v43 = vpop.f32.mrf.mxu0 }
  0xe4   :  { %v3618_v3 = vadd.f32 %v171_v43, %v3599_v28 }
  0xe5   :  { %v173_v17 = vpop.f32.mrf.mxu0 }
  0xe6   :  { %v467_v45 = vpop.f32.mrf.mxu1  ;;  %4623 = vst [vmem:[#allocation28_spill] sm:$0xff] %v3618_v3  ;;  %v3621_v0 = vadd.f32 %v173_v17, %v3605_v12 }
  0xe7   :  { %v468_v62 = vadd.f32 %v467_v45, %v389_v20 }
  0xe8   :  { %v469_v44 = vpop.f32.mrf.mxu1  ;;  %4624 = vst [vmem:[#allocation29_spill] sm:$0xff] %v3621_v0 }
  0xe9   :  { %v542_v61 = vadd.f32 %v468_v62, %v154_v24  ;;  %v470_v42 = vadd.f32 %v469_v44, %v393_v46 }
  0xeb   :  { %v543_v22 = vmax.f32 %v542_v61, -30.0  ;;  %v552_v41 = vadd.f32 %v470_v42, %v156_v4  ;;  %v177_v26 = vpop.f32.mrf.mxu0 }
  0xec   :  { %v3624_v20 = vadd.f32 %v177_v26, %v3599_v28 }
  0xed   :  { %v544_v63 = vsub.f32 0.0, %v543_v22  ;;  %v553_v1 = vmax.f32 %v552_v41, -30.0  ;;  %v179_v19 = vpop.f32.mrf.mxu0 }
  0xee   :  { %4625 = vst [vmem:[#allocation30_spill] sm:$0xff] %v3624_v20  ;;  %v3627_v43 = vadd.f32 %v179_v19, %v3605_v12 }
  0xef   :  { %v545_v60 = vmul.f32 1.442695, %v544_v63  ;;  %v554_v45 = vsub.f32 0.0, %v553_v1 }
  0xf0   :  { %4626 = vst [vmem:[#allocation31_spill] sm:$0xff] %v3627_v43 }
  0xf1   :  { %2946 = vpow2.f32 %v545_v60  ;;  %v555_v44 = vmul.f32 1.442695, %v554_v45  ;;  %v183_v46 = vpop.f32.mrf.mxu0 }
  0xf2   :  { %v3630_v42 = vadd.f32 %v183_v46, %v3599_v28  ;;  %v397_v46 = vrot.slane %v384_v11, %v3559_v2 }
  0xf3   :  { %2948 = vpow2.f32 %v555_v44  ;;  %v185_v61 = vpop.f32.mrf.mxu0 }
  0xf4   :  { %4627 = vst [vmem:[#allocation32_spill] sm:$0xff] %v3630_v42  ;;  %v3633_v41 = vadd.f32 %v185_v61, %v3605_v12 }
  0xf6   :  { %4628 = vst [vmem:[#allocation33_spill] sm:$0xff] %v3633_v41 }
  0xf7   :  { %v189_v62 = vpop.f32.mrf.mxu0 }
  0xf8   :  { %v3636_v22 = vadd.f32 %v189_v62, %v3599_v28 }
  0xf9   :  { %v191_v26 = vpop.f32.mrf.mxu0 }
  0xfa   :  { %4629 = vst [vmem:[#allocation34_spill] sm:$0xff] %v3636_v22  ;;  %v3639_v60 = vadd.f32 %v191_v26, %v3605_v12 }
  0xfc   :  { %4630 = vst [vmem:[#allocation35_spill] sm:$0xff] %v3639_v60 }
  0xfd   :  { %v195_v1 = vpop.f32.mrf.mxu0 }
  0xfe   :  { %v2947_v17 = vpop.eup %2946  ;;  %v3642_v4 = vadd.f32 %v195_v1, %v3599_v28 }
  0xff   :  { %v547_v24 = vadd.f32 1.0, %v2947_v17  ;;  %v267_v17 = vadd.f32 %v3570_v15, %v3565_v5  ;;  %v4633_v5 = vmov 0.0  }
 0x100   :  { %4631 = vst [vmem:[#allocation36_spill] sm:$0xff] %v3642_v4  ;;  %v2949_v63 = vpop.eup %2948 }
 0x101   :  { %2950 = vrcp.f32 %v547_v24  ;;  %v557_v45 = vadd.f32 1.0, %v2949_v63 }
 0x103   :  { %2952 = vrcp.f32 %v557_v45 }
 0x106   :  { %v538_v19 = vpop.f32.mrf.mxu1 }
 0x107   :  { %v539_v22 = vadd.f32 %v538_v19, %v397_v46 }
 0x108   :  { %v2654_v44 = vpop.f32.mrf.mxu1 }
 0x10e   :  { %v2951_v61 = vpop.eup %2950 }
 0x10f   :  { %v549_v62 = vmul.f32 %v2951_v61, %v547_v24 }
 0x110   :  { %v2953_v42 = vpop.eup %2952 }
 0x111   :  { %v550_v41 = vsub.f32 2.0, %v549_v62  ;;  %v559_v1 = vmul.f32 %v2953_v42, %v557_v45 }
 0x113   :  { %v551_v26 = vmul.f32 %v2951_v61, %v550_v41  ;;  %v560_v4 = vsub.f32 2.0, %v559_v1 }
 0x115   :  { %v562_v60 = vmul.f32 %v551_v26, %v539_v22  ;;  %v561_v63 = vmul.f32 %v2953_v42, %v560_v4 }
 0x117   :  { %v563_v43 = vadd.f32 %v562_v60, %v267_v17  ;;  %v565_v20 = vsub.f32 1.0, %v561_v63  ;;  %v567_v11 = vmul.f32 %v561_v63, %v3364_v47  ;;  %v4649_v63 = vld [vmem:[#allocation14_spill] sm:$0xff] }
 0x119   :  { %2954 = vtanh.f32 %v563_v43 }
 0x126   :  { %v2955_v44 = vpop.eup %2954 }
 0x127   :  { %v566_v0 = vmul.f32 %v2955_v44, %v565_v20 }
 0x129   :  { %v3648_v3 = vadd.f32 %v567_v11, %v566_v0 }
 0x12b   :  { %4632 = vst [vmem:[#allocation37_spill] sm:$0xff] %v3648_v3  ;;  %706 = vmatmul.mubr.f32.vlgmr.msra.gmra.mxu0 %v3648_v3  ;;  %2688 = vmatmul.mubr.f32.vlgmr.msra.gmra.mxu1 %v3648_v3 }
 0x12c   :  { %883 = vmatpush1.msra.mxu0 %v3105_v6  ;;  %2691 = vmatpush3.msra.mxu1 %v3371_v48  ;;  %v4634_v6 = vld [vmem:[#allocation10_spill] sm:$0xff] }
 0x12d   :  { %884 = vmatprep.subr.mxu0 %v3110_v7  ;;  %2692 = vmatprep.subr.mxu1 %v4633_v5  ;;  %v4635_v7 = vld [vmem:[#allocation4_spill] sm:$0xff] }
 0x12e   :  { %885 = vmatpush1.msra.mxu0 %v3118_v8  ;;  %2693 = vmatpush3.msra.mxu1 %v3381_v49  ;;  %v4636_v8 = vld [vmem:[#allocation5_spill] sm:$0xff] }
 0x12f   :  { %886 = vmatprep.subr.mxu0 %v3124_v9  ;;  %2694 = vmatprep.subr.mxu1 %v4633_v5  ;;  %v4637_v9 = vld [vmem:[#allocation11_spill] sm:$0xff] }
 0x130   :  { %887 = vmatpush1.msra.mxu0 %v3130_v10  ;;  %2695 = vmatpush3.msra.mxu1 %v3390_v50  ;;  %v4638_v10 = vld [vmem:[#allocation6_spill] sm:$0xff] }
 0x131   :  { %888 = vmatprep.subr.mxu0 %v3146_v13  ;;  %2696 = vmatprep.subr.mxu1 %v4633_v5  ;;  %v4639_v13 = vld [vmem:[#allocation7_spill] sm:$0xff] }
 0x132   :  { %889 = vmatpush1.msra.mxu0 %v3154_v14  ;;  %2697 = vmatpush3.msra.mxu1 %v3400_v51  ;;  %v4640_v14 = vld [vmem:[#allocation12_spill] sm:$0xff] }
 0x133   :  { %890 = vmatprep.subr.mxu0 %v3167_v16  ;;  %2698 = vmatprep.subr.mxu1 %v4633_v5  ;;  %v4641_v16 = vld [vmem:[#allocation8_spill] sm:$0xff] }
 0x134   :  { %891 = vmatpush1.msra.mxu0 %v3180_v18  ;;  %2699 = vmatpush3.msra.mxu1 %v3409_v52  ;;  %v4642_v18 = vld [vmem:[#allocation9_spill] sm:$0xff] }
 0x135   :  { %892 = vmatprep.subr.mxu0 %v3194_v21  ;;  %2700 = vmatprep.subr.mxu1 %v4633_v5  ;;  %v4643_v21 = vld [vmem:[#allocation13_spill] sm:$0xff] }
 0x136   :  { %893 = vmatpush1.msra.mxu0 %v3203_v23  ;;  %2701 = vmatpush3.msra.mxu1 %v3418_v53  ;;  %v624_v23 = vld [vmem:[%s4555_s5] sm:$0x7] }
 0x137   :  { %894 = vmatprep.subr.mxu0 %v3214_v25  ;;  %2702 = vmatprep.subr.mxu1 %v4633_v5  ;;  %v4644_v25 = vld [vmem:[#allocation22_spill] sm:$0xff]  ;;  %v637_v19 = vrot.slane %v624_v23, %v3559_v2 }
 0x138   :  { %895 = vmatpush1.msra.mxu0 %v3227_v27  ;;  %2703 = vmatpush3.msra.mxu1 %v3428_v54  ;;  %v629_v27 = vrot.slane %v624_v23, %v4644_v25 }
 0x139   :  { %896 = vmatprep.subr.mxu0 %v3236_v29  ;;  %2704 = vmatprep.subr.mxu1 %v4633_v5  ;;  %v3722_v29 = vpop.f32.mrf.mxu0 }
 0x13a   :  { %897 = vmatpush1.msra.mxu0 %v3242_v30  ;;  %2705 = vmatpush3.msra.mxu1 %v3437_v55  ;;  %4645 = vst [vmem:[#allocation10_spill] sm:$0xff] %v3722_v29  ;;  %v4646_v30 = vld [vmem:[#allocation24_spill] sm:$0xff] }
 0x13b   :  { %898 = vmatprep.subr.mxu0 %v3250_v31  ;;  %2706 = vmatprep.subr.mxu1 %v4633_v5  ;;  %v633_v31 = vrot.slane %v624_v23, %v4646_v30  ;;  %v3848_v23 = vld [vmem:[%s4552_s3 + $0xc8] sm:$0xff] }
 0x13c   :  { %899 = vmatpush1.msra.mxu0 %v3256_v32  ;;  %2707 = vmatpush3.msra.mxu1 %v3446_v56 }
 0x13d   :  { %900 = vmatprep.subr.mxu0 %v3264_v33  ;;  %2708 = vmatprep.subr.mxu1 %v4633_v5 }
 0x13e   :  { %901 = vmatpush1.msra.mxu0 %v3271_v34  ;;  %2709 = vmatpush3.msra.mxu1 %v3456_v57  ;;  %v4647_v34 = vld [vmem:[#allocation21_spill] sm:$0xff] }
 0x13f   :  { %902 = vmatprep.subr.mxu0 %v3278_v35  ;;  %2710 = vmatprep.subr.mxu1 %v4633_v5  ;;  %v160_v35 = vadd.f32 %v4647_v34, %v3599_v28  ;;  %v3876_v34 = vld [vmem:[%s4552_s3 + $0x90] sm:$0xff] }
 0x140   :  { %903 = vmatpush1.msra.mxu0 %v3285_v36  ;;  %2711 = vmatpush3.msra.mxu1 %v3465_v58 }
 0x141   :  { %904 = vmatprep.subr.mxu0 %v3292_v37  ;;  %2712 = vmatprep.subr.mxu1 %v4633_v5 }
 0x142   :  { %905 = vmatpush1.msra.mxu0 %v3299_v38  ;;  %2713 = vmatpush3.msra.mxu1 %v3474_v59 }
 0x143   :  { %906 = vmatprep.subr.mxu0 %v3307_v39  ;;  %2714 = vmatprep.subr.mxu1 %v4633_v5  ;;  %v4648_v39 = vld [vmem:[#allocation23_spill] sm:$0xff] }
 0x144   :  { %907 = vmatpush1.msra.mxu0 %v3314_v40  ;;  %2715 = vmatpush3.msra.mxu1 %v4634_v6  ;;  %v162_v40 = vadd.f32 %v4648_v39, %v3605_v12  ;;  %v3905_v39 = vld [vmem:[%s4552_s3 + $0x68] sm:$0xff] }
 0x145   :  { %908 = vmatprep.subr.mxu0 %v4635_v7  ;;  %2716 = vmatprep.subr.mxu1 %v4633_v5 }
 0x146   :  { %909 = vmatpush1.msra.mxu0 %v4636_v8  ;;  %2717 = vmatpush3.msra.mxu1 %v4637_v9 }
 0x147   :  { %910 = vmatprep.subr.mxu0 %v4638_v10  ;;  %2718 = vmatprep.subr.mxu1 %v4633_v5 }
 0x148   :  { %911 = vmatpush1.msra.mxu0 %v4639_v13  ;;  %2719 = vmatpush3.msra.mxu1 %v4640_v14 }
 0x149   :  { %912 = vmatprep.subr.mxu0 %v4641_v16  ;;  %2720 = vmatprep.subr.mxu1 %v4633_v5  ;;  %v3830_v16 = vld [vmem:[%s4552_s3 + $0xf0] sm:$0xff] }
 0x14a   :  { %913 = vmatpush1.msra.mxu0 %v4642_v18  ;;  %946 = vmatprep.mubr.f32.mxu0 %v4633_v5  ;;  %v3836_v18 = vld [vmem:[%s4552_s3 + $0xe0] sm:$0xff] }
 0x14b   :  { %2721 = vmatpush3.msra.mxu1 %v4643_v21  ;;  %2722 = vmatprep.mubr.msk.f32.mxu1 %vm3027_vm1, %v4633_v5  ;;  %v3842_v21 = vld [vmem:[%s4552_s3 + $0xd8] sm:$0xff] }
 0x14c   :  { %2725 = vmatprep.subr.mxu1 %v4633_v5 }
 0x1eb   :  { %v707_v32 = vpop.f32.mrf.mxu0  ;;  %v778_v33 = vpop.f32.mrf.mxu1 }
 0x1ec   :  { %v708_v36 = vadd.f32 %v707_v32, %v629_v27  ;;  %v779_v62 = vadd.f32 %v778_v33, %v637_v19  ;;  %v3854_v27 = vld [vmem:[%s4552_s3 + $0xc0] sm:$0xff]  ;;  %v3864_v32 = vld [vmem:[%s4552_s3 + $0xa8] sm:$0xff]  ;;  %v3870_v33 = vld [vmem:[%s4552_s3 + $0x98] sm:$0xff] }
 0x1ed   :  { %v709_v37 = vpop.f32.mrf.mxu0  ;;  %v2689_v38 = vpop.f32.mrf.mxu1 }
 0x1ee   :  { %v782_v47 = vadd.f32 %v708_v36, %v160_v35  ;;  %v710_v59 = vadd.f32 %v709_v37, %v633_v31  ;;  %v3859_v31 = vld [vmem:[%s4552_s3 + $0xb0] sm:$0xff]  ;;  %v3882_v35 = vld [vmem:[%s4552_s3 + $0x80] sm:$0xff]  ;;  %v3893_v37 = vld [vmem:[%s4552_s3 + $0x78] sm:$0xff] }
 0x1ef   :  { %v3887_v36 = vld [vmem:[%s4552_s3 + $0x70] sm:$0xff]  ;;  %v3899_v38 = vld [vmem:[%s4552_s3 + $0x58] sm:$0xff] }
 0x1f0   :  { %v783_v15 = vmax.f32 %v782_v47, -30.0  ;;  %v792_v0 = vadd.f32 %v710_v59, %v162_v40  ;;  %v3911_v40 = vld [vmem:[%s4552_s3 + $0x40] sm:$0xff]  ;;  %v3924_v59 = vld [vmem:[%s4552_s3 + $0x50] sm:$0xff] }
 0x1f1   :  { %4652 = vst [vmem:[#allocation11_spill] sm:$0xff] %v3911_v40  ;;  %v3917_v47 = vld [vmem:[%s4552_s3 + $0x60] sm:$0xff] }
 0x1f2   :  { %v784_v20 = vsub.f32 0.0, %v783_v15  ;;  %v793_v43 = vmax.f32 %v792_v0, -30.0  ;;  %v3930_v15 = vld [vmem:[%s4552_s3 + $0x28] sm:$0xff] }
 0x1f3   :  { %4653 = vst [vmem:[#allocation6_spill] sm:$0xff] %v3930_v15  ;;  %v3936_v0 = vld [vmem:[%s4552_s3 + $0x48] sm:$0xff] }
 0x1f4   :  { %v785_v42 = vmul.f32 1.442695, %v784_v20  ;;  %v794_v41 = vsub.f32 0.0, %v793_v43  ;;  %v3943_v20 = vld [vmem:[%s4552_s3 + $0x38] sm:$0xff]  ;;  %v3949_v43 = vld [vmem:[%s4552_s3 + $0x10] sm:$0xff] }
 0x1f5   :  { %4654 = vst [vmem:[#allocation7_spill] sm:$0xff] %v3949_v43 }
 0x1f6   :  { %2956 = vpow2.f32 %v785_v42  ;;  %v795_v22 = vmul.f32 1.442695, %v794_v41  ;;  %v3955_v42 = vld [vmem:[%s4552_s3 + $0x30] sm:$0xff]  ;;  %v3962_v41 = vld [vmem:[%s4552_s3 + $0x20] sm:$0xff] }
 0x1f7   :  { %4655 = vst [vmem:[#allocation12_spill] sm:$0xff] %v3955_v42  ;;  %4656 = vst [vmem:[#allocation8_spill] sm:$0xff] %v3962_v41 }
 0x1f8   :  { %2958 = vpow2.f32 %v795_v22  ;;  %v3969_v22 = vld [vmem:[%s4552_s3 + $0x18] sm:$0xff] }
 0x1f9   :  { %4657 = vst [vmem:[#allocation9_spill] sm:$0xff] %v3969_v22 }
 0x203   :  { %v2957_v60 = vpop.eup %2956 }
 0x204   :  { %v787_v24 = vadd.f32 1.0, %v2957_v60  ;;  %v3976_v60 = vld [vmem:[%s4552_s3 + $0x8] sm:$0xff] }
 0x205   :  { %v2959_v28 = vpop.eup %2958  ;;  %4658 = vst [vmem:[#allocation13_spill] sm:$0xff] %v3976_v60 }
 0x206   :  { %2960 = vrcp.f32 %v787_v24  ;;  %v797_v4 = vadd.f32 1.0, %v2959_v28  ;;  %v865_v28 = vld [vmem:[%s4555_s5] sm:$0x7] }
 0x208   :  { %2962 = vrcp.f32 %v797_v4 }
 0x213   :  { %v2961_v45 = vpop.eup %2960 }
 0x214   :  { %v789_v46 = vmul.f32 %v2961_v45, %v787_v24  ;;  %v3983_v24 = vld [vmem:[%s4552_s3] sm:$0xff] }
 0x215   :  { %v2963_v1 = vpop.eup %2962  ;;  %4659 = vst [vmem:[#allocation21_spill] sm:$0xff] %v3983_v24 }
 0x216   :  { %v790_v61 = vsub.f32 2.0, %v789_v46  ;;  %v799_v11 = vmul.f32 %v2963_v1, %v797_v4  ;;  %v870_v4 = vrot.slane %v865_v28, %v4644_v25 }
 0x218   :  { %v791_v26 = vmul.f32 %v2961_v45, %v790_v61  ;;  %v800_v6 = vsub.f32 2.0, %v799_v11  ;;  %v874_v45 = vrot.slane %v865_v28, %v4646_v30  ;;  %v4661_v11 = vld [vmem:[#allocation27_spill] sm:$0xff] }
 0x21a   :  { %v802_v17 = vmul.f32 %v791_v26, %v779_v62  ;;  %v801_v7 = vmul.f32 %v2963_v1, %v800_v6 }
 0x21c   :  { %v803_v44 = vadd.f32 %v802_v17, %v4649_v63  ;;  %v805_v8 = vsub.f32 1.0, %v801_v7  ;;  %v807_v13 = vmul.f32 %v801_v7, %v3648_v3  ;;  %v4660_v17 = vld [vmem:[#allocation26_spill] sm:$0xff] }
 0x21e   :  { %2964 = vtanh.f32 %v803_v44 }
 0x22b   :  { %v2965_v9 = vpop.eup %2964 }
 0x22c   :  { %v806_v10 = vmul.f32 %v2965_v9, %v805_v8 }
 0x22e   :  { %v3732_v14 = vadd.f32 %v807_v13, %v806_v10 }
 0x230   :  { %4650 = vst [vmem:[#allocation4_spill] sm:$0xff] %v3732_v14  ;;  %947 = vmatmul.mubr.f32.vlgmr.msra.gmra.mxu0 %v3732_v14  ;;  %2723 = vmatmul.mubr.f32.vlgmr.msra.gmra.mxu1 %v3732_v14 }
 0x231   :  { %2726 = vmatpush3.msra.mxu1 %v3371_v48  ;;  %1187 = vmatprep.mubr.f32.mxu0 %v4633_v5  ;;  %v3764_v48 = vld [vmem:[%s4552_s3 + $0x170] sm:$0xff] }
 0x232   :  { %2727 = vmatprep.subr.mxu1 %v4633_v5  ;;  %2757 = vmatprep.mubr.msk.f32.mxu1 %vm3027_vm1, %v4633_v5  ;;  %4651 = vst [vmem:[#allocation5_spill] sm:$0xff] %v3764_v48 }
 0x233   :  { %2728 = vmatpush3.msra.mxu1 %v3381_v49  ;;  %1123 = vmatprep.subr.mxu0 %v3764_v48  ;;  %v3770_v49 = vld [vmem:[%s4552_s3 + $0x168] sm:$0xff] }
 0x234   :  { %2729 = vmatprep.subr.mxu1 %v4633_v5  ;;  %1124 = vmatpush1.msra.mxu0 %v3770_v49 }
 0x235   :  { %2730 = vmatpush3.msra.mxu1 %v3390_v50  ;;  %v3776_v50 = vld [vmem:[%s4552_s3 + $0x158] sm:$0xff] }
 0x236   :  { %2731 = vmatprep.subr.mxu1 %v4633_v5  ;;  %1125 = vmatprep.subr.mxu0 %v3776_v50 }
 0x237   :  { %2732 = vmatpush3.msra.mxu1 %v3400_v51  ;;  %v3782_v51 = vld [vmem:[%s4552_s3 + $0x150] sm:$0xff] }
 0x238   :  { %2733 = vmatprep.subr.mxu1 %v4633_v5  ;;  %1126 = vmatpush1.msra.mxu0 %v3782_v51 }
 0x239   :  { %2734 = vmatpush3.msra.mxu1 %v3409_v52  ;;  %v3788_v52 = vld [vmem:[%s4552_s3 + $0x140] sm:$0xff] }
 0x23a   :  { %2735 = vmatprep.subr.mxu1 %v4633_v5  ;;  %1127 = vmatprep.subr.mxu0 %v3788_v52 }
 0x23b   :  { %2736 = vmatpush3.msra.mxu1 %v3418_v53  ;;  %v3794_v53 = vld [vmem:[%s4552_s3 + $0x138] sm:$0xff] }
 0x23c   :  { %2737 = vmatprep.subr.mxu1 %v4633_v5  ;;  %1128 = vmatpush1.msra.mxu0 %v3794_v53 }
 0x23d   :  { %2738 = vmatpush3.msra.mxu1 %v3428_v54  ;;  %v3800_v54 = vld [vmem:[%s4552_s3 + $0x128] sm:$0xff] }
 0x23e   :  { %2739 = vmatprep.subr.mxu1 %v4633_v5  ;;  %1129 = vmatprep.subr.mxu0 %v3800_v54 }
 0x23f   :  { %2740 = vmatpush3.msra.mxu1 %v3437_v55  ;;  %v3806_v55 = vld [vmem:[%s4552_s3 + $0x120] sm:$0xff] }
 0x240   :  { %2741 = vmatprep.subr.mxu1 %v4633_v5  ;;  %1130 = vmatpush1.msra.mxu0 %v3806_v55 }
 0x241   :  { %2742 = vmatpush3.msra.mxu1 %v3446_v56  ;;  %v3812_v56 = vld [vmem:[%s4552_s3 + $0x110] sm:$0xff] }
 0x242   :  { %2743 = vmatprep.subr.mxu1 %v4633_v5  ;;  %1131 = vmatprep.subr.mxu0 %v3812_v56 }
 0x243   :  { %2744 = vmatpush3.msra.mxu1 %v3456_v57  ;;  %v3818_v57 = vld [vmem:[%s4552_s3 + $0x108] sm:$0xff] }
 0x244   :  { %2745 = vmatprep.subr.mxu1 %v4633_v5  ;;  %1132 = vmatpush1.msra.mxu0 %v3818_v57 }
 0x245   :  { %2746 = vmatpush3.msra.mxu1 %v3465_v58  ;;  %v3824_v58 = vld [vmem:[%s4552_s3 + $0xf8] sm:$0xff] }
 0x246   :  { %2747 = vmatprep.subr.mxu1 %v4633_v5  ;;  %1133 = vmatprep.subr.mxu0 %v3824_v58 }
 0x247   :  { %1134 = vmatpush1.msra.mxu0 %v3830_v16  ;;  %2748 = vmatpush3.msra.mxu1 %v3887_v36 }
 0x248   :  { %1135 = vmatprep.subr.mxu0 %v3836_v18  ;;  %2749 = vmatprep.subr.mxu1 %v4633_v5 }
 0x249   :  { %1136 = vmatpush1.msra.mxu0 %v3842_v21  ;;  %2750 = vmatpush3.msra.mxu1 %v3899_v38 }
 0x24a   :  { %1137 = vmatprep.subr.mxu0 %v3848_v23  ;;  %2751 = vmatprep.subr.mxu1 %v4633_v5 }
 0x24b   :  { %1138 = vmatpush1.msra.mxu0 %v3854_v27  ;;  %2752 = vmatpush3.msra.mxu1 %v3911_v40 }
 0x24c   :  { %1139 = vmatprep.subr.mxu0 %v3859_v31  ;;  %2753 = vmatprep.subr.mxu1 %v4633_v5 }
 0x24d   :  { %1140 = vmatpush1.msra.mxu0 %v3864_v32  ;;  %2754 = vmatpush3.msra.mxu1 %v3930_v15 }
 0x24e   :  { %1141 = vmatprep.subr.mxu0 %v3870_v33  ;;  %2755 = vmatprep.subr.mxu1 %v4633_v5 }
 0x24f   :  { %1142 = vmatpush1.msra.mxu0 %v3876_v34  ;;  %2756 = vmatpush3.msra.mxu1 %v3949_v43 }
 0x250   :  { %1143 = vmatprep.subr.mxu0 %v3882_v35  ;;  %2760 = vmatprep.subr.mxu1 %v4633_v5 }
 0x251   :  { %1144 = vmatpush1.msra.mxu0 %v3893_v37 }
 0x252   :  { %1145 = vmatprep.subr.mxu0 %v3905_v39 }
 0x253   :  { %1146 = vmatpush1.msra.mxu0 %v3917_v47 }
 0x254   :  { %1147 = vmatprep.subr.mxu0 %v3924_v59 }
 0x255   :  { %1148 = vmatpush1.msra.mxu0 %v3936_v0 }
 0x256   :  { %1149 = vmatprep.subr.mxu0 %v3943_v20 }
 0x257   :  { %1150 = vmatpush1.msra.mxu0 %v3955_v42 }
 0x258   :  { %1151 = vmatprep.subr.mxu0 %v3962_v41 }
 0x259   :  { %1152 = vmatpush1.msra.mxu0 %v3969_v22 }
 0x25a   :  { %1153 = vmatprep.subr.mxu0 %v3976_v60 }
 0x25b   :  { %1154 = vmatpush1.msra.mxu0 %v3983_v24 }
 0x25c   :  { %1364 = vmatprep.subr.mxu0 %v3764_v48 }
 0x2f0   :  { %v948_v19 = vpop.f32.mrf.mxu0  ;;  %v1019_v46 = vpop.f32.mrf.mxu1 }
 0x2f1   :  { %v949_v61 = vadd.f32 %v948_v19, %v870_v4 }
 0x2f2   :  { %v950_v62 = vpop.f32.mrf.mxu0  ;;  %v2724_v26 = vpop.f32.mrf.mxu1 }
 0x2f3   :  { %v1023_v1 = vadd.f32 %v949_v61, %v4660_v17  ;;  %v951_v63 = vadd.f32 %v950_v62, %v874_v45  ;;  %v878_v61 = vrot.slane %v865_v28, %v3559_v2  ;;  %v4048_v28 = vld [vmem:[%s4552_s3 + $0x160] sm:$0xff] }
 0x2f5   :  { %v1024_v44 = vmax.f32 %v1023_v1, -30.0  ;;  %v1033_v6 = vadd.f32 %v951_v63, %v4661_v11  ;;  %v1020_v26 = vadd.f32 %v1019_v46, %v878_v61  ;;  %v4055_v46 = vld [vmem:[%s4552_s3 + $0x148] sm:$0xff]  ;;  %v4076_v61 = vld [vmem:[%s4552_s3 + $0x100] sm:$0xff] }
 0x2f7   :  { %v1025_v7 = vsub.f32 0.0, %v1024_v44  ;;  %v1034_v8 = vmax.f32 %v1033_v6, -30.0  ;;  %v4662_v44 = vld [vmem:[#allocation16_spill] sm:$0xff] }
 0x2f9   :  { %v1026_v9 = vmul.f32 1.442695, %v1025_v7  ;;  %v1035_v10 = vsub.f32 0.0, %v1034_v8 }
 0x2fb   :  { %2966 = vpow2.f32 %v1026_v9  ;;  %v1036_v13 = vmul.f32 1.442695, %v1035_v10 }
 0x2fd   :  { %2968 = vpow2.f32 %v1036_v13 }
 0x308   :  { %v2967_v29 = vpop.eup %2966 }
 0x309   :  { %v1028_v12 = vadd.f32 1.0, %v2967_v29 }
 0x30a   :  { %v2969_v3 = vpop.eup %2968 }
 0x30b   :  { %2970 = vrcp.f32 %v1028_v12  ;;  %v1038_v4 = vadd.f32 1.0, %v2969_v3 }
 0x30d   :  { %2972 = vrcp.f32 %v1038_v4 }
 0x318   :  { %v2971_v19 = vpop.eup %2970 }
 0x319   :  { %v1030_v45 = vmul.f32 %v2971_v19, %v1028_v12  ;;  %v4041_v12 = vld [vmem:[%s4552_s3 + $0x178] sm:$0xff] }
 0x31a   :  { %v2973_v63 = vpop.eup %2972 }
 0x31b   :  { %v1031_v62 = vsub.f32 2.0, %v1030_v45  ;;  %v1040_v6 = vmul.f32 %v2973_v63, %v1038_v4  ;;  %v4062_v4 = vld [vmem:[%s4552_s3 + $0x130] sm:$0xff]  ;;  %v4083_v45 = vld [vmem:[%s4552_s3 + $0xe8] sm:$0xff] }
 0x31d   :  { %v1032_v17 = vmul.f32 %v2971_v19, %v1031_v62  ;;  %v1041_v7 = vsub.f32 2.0, %v1040_v6  ;;  %v4069_v19 = vld [vmem:[%s4552_s3 + $0x118] sm:$0xff]  ;;  %v4090_v62 = vld [vmem:[%s4552_s3 + $0xd0] sm:$0xff] }
 0x31f   :  { %v1043_v1 = vmul.f32 %v1032_v17, %v1020_v26  ;;  %v1042_v8 = vmul.f32 %v2973_v63, %v1041_v7  ;;  %v4095_v26 = vld [vmem:[%s4552_s3 + $0xb8] sm:$0xff]  ;;  %v4102_v17 = vld [vmem:[%s4552_s3 + $0xa0] sm:$0xff] }
 0x320   :  { %v1106_v63 = vld [vmem:[%s4555_s5] sm:$0x7] }
 0x321   :  { %v1044_v11 = vadd.f32 %v1043_v1, %v4662_v44  ;;  %v1046_v29 = vsub.f32 1.0, %v1042_v8  ;;  %v1048_v3 = vmul.f32 %v1042_v8, %v3732_v14  ;;  %v4109_v1 = vld [vmem:[%s4552_s3 + $0x88] sm:$0xff]  ;;  %v1111_v44 = vrot.slane %v1106_v63, %v4644_v25 }
 0x323   :  { %2974 = vtanh.f32 %v1044_v11  ;;  %v1115_v11 = vrot.slane %v1106_v63, %v4646_v30 }
 0x330   :  { %v2975_v9 = vpop.eup %2974 }
 0x331   :  { %v1047_v10 = vmul.f32 %v2975_v9, %v1046_v29 }
 0x333   :  { %v3999_v13 = vadd.f32 %v1048_v3, %v1047_v10  ;;  %v4664_v10 = vld [vmem:[#allocation28_spill] sm:$0xff] }
 0x335   :  { %4663 = vst [vmem:[#allocation23_spill] sm:$0xff] %v3999_v13  ;;  %1188 = vmatmul.mubr.f32.vlgmr.msra.gmra.mxu0 %v3999_v13  ;;  %2758 = vmatmul.mubr.f32.vlgmr.msra.gmra.mxu1 %v3999_v13 }
 0x336   :  { %1365 = vmatpush1.msra.mxu0 %v3770_v49  ;;  %1428 = vmatprep.mubr.f32.mxu0 %v4633_v5 }
 0x337   :  { %1366 = vmatprep.subr.mxu0 %v3776_v50  ;;  %2792 = vmatprep.mubr.msk.f32.mxu1 %vm3027_vm1, %v4633_v5 }
 0x338   :  { %1367 = vmatpush1.msra.mxu0 %v3782_v51  ;;  %2761 = vmatpush3.msra.mxu1 %v4041_v12 }
 0x339   :  { %1368 = vmatprep.subr.mxu0 %v3788_v52  ;;  %2762 = vmatprep.subr.mxu1 %v4633_v5 }
 0x33a   :  { %1369 = vmatpush1.msra.mxu0 %v3794_v53  ;;  %2763 = vmatpush3.msra.mxu1 %v4048_v28 }
 0x33b   :  { %1370 = vmatprep.subr.mxu0 %v3800_v54  ;;  %2764 = vmatprep.subr.mxu1 %v4633_v5 }
 0x33c   :  { %1371 = vmatpush1.msra.mxu0 %v3806_v55  ;;  %2765 = vmatpush3.msra.mxu1 %v4055_v46 }
 0x33d   :  { %1372 = vmatprep.subr.mxu0 %v3812_v56  ;;  %2766 = vmatprep.subr.mxu1 %v4633_v5 }
 0x33e   :  { %1373 = vmatpush1.msra.mxu0 %v3818_v57  ;;  %2767 = vmatpush3.msra.mxu1 %v4062_v4 }
 0x33f   :  { %1374 = vmatprep.subr.mxu0 %v3824_v58  ;;  %2768 = vmatprep.subr.mxu1 %v4633_v5 }
 0x340   :  { %1375 = vmatpush1.msra.mxu0 %v3830_v16  ;;  %2769 = vmatpush3.msra.mxu1 %v4069_v19 }
 0x341   :  { %1376 = vmatprep.subr.mxu0 %v3836_v18  ;;  %2770 = vmatprep.subr.mxu1 %v4633_v5 }
 0x342   :  { %1377 = vmatpush1.msra.mxu0 %v3842_v21  ;;  %2771 = vmatpush3.msra.mxu1 %v4076_v61 }
 0x343   :  { %1378 = vmatprep.subr.mxu0 %v3848_v23  ;;  %2772 = vmatprep.subr.mxu1 %v4633_v5 }
 0x344   :  { %1379 = vmatpush1.msra.mxu0 %v3854_v27  ;;  %2773 = vmatpush3.msra.mxu1 %v4083_v45 }
 0x345   :  { %1380 = vmatprep.subr.mxu0 %v3859_v31  ;;  %2774 = vmatprep.subr.mxu1 %v4633_v5 }
 0x346   :  { %1381 = vmatpush1.msra.mxu0 %v3864_v32  ;;  %2775 = vmatpush3.msra.mxu1 %v4090_v62 }
 0x347   :  { %1382 = vmatprep.subr.mxu0 %v3870_v33  ;;  %2776 = vmatprep.subr.mxu1 %v4633_v5 }
 0x348   :  { %1383 = vmatpush1.msra.mxu0 %v3876_v34  ;;  %2777 = vmatpush3.msra.mxu1 %v4095_v26 }
 0x349   :  { %1384 = vmatprep.subr.mxu0 %v3882_v35  ;;  %2778 = vmatprep.subr.mxu1 %v4633_v5 }
 0x34a   :  { %1385 = vmatpush1.msra.mxu0 %v3893_v37  ;;  %2779 = vmatpush3.msra.mxu1 %v4102_v17 }
 0x34b   :  { %1386 = vmatprep.subr.mxu0 %v3905_v39  ;;  %2780 = vmatprep.subr.mxu1 %v4633_v5 }
 0x34c   :  { %1387 = vmatpush1.msra.mxu0 %v3917_v47  ;;  %2781 = vmatpush3.msra.mxu1 %v4109_v1 }
 0x34d   :  { %1388 = vmatprep.subr.mxu0 %v3924_v59  ;;  %2782 = vmatprep.subr.mxu1 %v4633_v5 }
 0x34e   :  { %1389 = vmatpush1.msra.mxu0 %v3936_v0  ;;  %2783 = vmatpush3.msra.mxu1 %v3887_v36 }
 0x34f   :  { %1390 = vmatprep.subr.mxu0 %v3943_v20  ;;  %2784 = vmatprep.subr.mxu1 %v4633_v5 }
 0x350   :  { %1391 = vmatpush1.msra.mxu0 %v3955_v42  ;;  %2785 = vmatpush3.msra.mxu1 %v3899_v38 }
 0x351   :  { %1392 = vmatprep.subr.mxu0 %v3962_v41  ;;  %2786 = vmatprep.subr.mxu1 %v4633_v5 }
 0x352   :  { %1393 = vmatpush1.msra.mxu0 %v3969_v22  ;;  %2787 = vmatpush3.msra.mxu1 %v3911_v40 }
 0x353   :  { %1394 = vmatprep.subr.mxu0 %v3976_v60  ;;  %2788 = vmatprep.subr.mxu1 %v4633_v5 }
 0x354   :  { %1395 = vmatpush1.msra.mxu0 %v3983_v24  ;;  %2789 = vmatpush3.msra.mxu1 %v3930_v15 }
 0x355   :  { %1605 = vmatprep.subr.mxu0 %v3764_v48  ;;  %2790 = vmatprep.subr.mxu1 %v4633_v5 }
 0x356   :  { %2791 = vmatpush3.msra.mxu1 %v3949_v43  ;;  %v4665_v43 = vld [vmem:[#allocation29_spill] sm:$0xff] }
 0x357   :  { %2795 = vmatprep.subr.mxu1 %v4633_v5 }
 0x3f5   :  { %v1189_v6 = vpop.f32.mrf.mxu0  ;;  %v1260_v7 = vpop.f32.mrf.mxu1 }
 0x3f6   :  { %v1190_v8 = vadd.f32 %v1189_v6, %v1111_v44 }
 0x3f7   :  { %v1191_v29 = vpop.f32.mrf.mxu0  ;;  %v2759_v9 = vpop.f32.mrf.mxu1 }
 0x3f8   :  { %v1264_v3 = vadd.f32 %v1190_v8, %v4664_v10  ;;  %v1192_v14 = vadd.f32 %v1191_v29, %v1115_v11  ;;  %v1119_v8 = vrot.slane %v1106_v63, %v3559_v2  ;;  %v4668_v63 = vld [vmem:[#allocation11_spill] sm:$0xff] }
 0x3fa   :  { %v1265_v48 = vmax.f32 %v1264_v3, -30.0  ;;  %v1274_v24 = vadd.f32 %v1192_v14, %v4665_v43  ;;  %v1261_v9 = vadd.f32 %v1260_v7, %v1119_v8  ;;  %v4669_v7 = vld [vmem:[#allocation8_spill] sm:$0xff]  ;;  %v4672_v8 = vld [vmem:[#allocation13_spill] sm:$0xff] }
 0x3fc   :  { %v1266_v60 = vsub.f32 0.0, %v1265_v48  ;;  %v1275_v15 = vmax.f32 %v1274_v24, -30.0 }
 0x3fe   :  { %v1267_v22 = vmul.f32 1.442695, %v1266_v60  ;;  %v1276_v41 = vsub.f32 0.0, %v1275_v15  ;;  %v4666_v60 = vld [vmem:[#allocation15_spill] sm:$0xff] }
 0x400   :  { %2976 = vpow2.f32 %v1267_v22  ;;  %v1277_v40 = vmul.f32 1.442695, %v1276_v41 }
 0x402   :  { %2978 = vpow2.f32 %v1277_v40 }
 0x40d   :  { %v2977_v25 = vpop.eup %2976 }
 0x40e   :  { %v1269_v30 = vadd.f32 1.0, %v2977_v25 }
 0x40f   :  { %v2979_v42 = vpop.eup %2978 }
 0x410   :  { %2980 = vrcp.f32 %v1269_v30  ;;  %v1279_v44 = vadd.f32 1.0, %v2979_v42 }
 0x412   :  { %2982 = vrcp.f32 %v1279_v44 }
 0x41d   :  { %v2981_v6 = vpop.eup %2980 }
 0x41e   :  { %v1271_v11 = vmul.f32 %v2981_v6, %v1269_v30  ;;  %v4667_v30 = vld [vmem:[#allocation12_spill] sm:$0xff] }
 0x41f   :  { %v2983_v43 = vpop.eup %2982 }
 0x420   :  { %v1272_v29 = vsub.f32 2.0, %v1271_v11  ;;  %v1281_v41 = vmul.f32 %v2983_v43, %v1279_v44  ;;  %v4670_v44 = vld [vmem:[#allocation9_spill] sm:$0xff] }
 0x421   :  { %v4673_v11 = vld [vmem:[#allocation21_spill] sm:$0xff] }
 0x422   :  { %v1273_v14 = vmul.f32 %v2981_v6, %v1272_v29  ;;  %v1282_v40 = vsub.f32 2.0, %v1281_v41  ;;  %v4671_v6 = vld [vmem:[#allocation6_spill] sm:$0xff]  ;;  %v4674_v29 = vld [vmem:[#allocation7_spill] sm:$0xff] }
 0x424   :  { %v1284_v48 = vmul.f32 %v1273_v14, %v1261_v9  ;;  %v1283_v22 = vmul.f32 %v2983_v43, %v1282_v40  ;;  %v4675_v9 = vld [vmem:[#allocation5_spill] sm:$0xff]  ;;  %v1347_v14 = vld [vmem:[%s4555_s5] sm:$0x7] }
 0x426   :  { %v1285_v15 = vadd.f32 %v1284_v48, %v4666_v60  ;;  %v1287_v25 = vsub.f32 1.0, %v1283_v22  ;;  %v1289_v42 = vmul.f32 %v1283_v22, %v3999_v13  ;;  %v4676_v48 = vld [vmem:[#allocation22_spill] sm:$0xff]  ;;  %v4677_v60 = vld [vmem:[#allocation24_spill] sm:$0xff] }
 0x427   :  { %v1352_v43 = vrot.slane %v1347_v14, %v4676_v48 }
 0x428   :  { %2984 = vtanh.f32 %v1285_v15  ;;  %v1356_v15 = vrot.slane %v1347_v14, %v4677_v60 }
 0x435   :  { %v2985_v24 = vpop.eup %2984 }
 0x436   :  { %v1288_v10 = vmul.f32 %v2985_v24, %v1287_v25 }
 0x438   :  { %v4135_v3 = vadd.f32 %v1289_v42, %v1288_v10  ;;  %v4678_v10 = vld [vmem:[#allocation30_spill] sm:$0xff] }
 0x43a   :  { %1429 = vmatmul.mubr.f32.vlgmr.msra.gmra.mxu0 %v4135_v3  ;;  %2793 = vmatmul.mubr.f32.vlgmr.msra.gmra.mxu1 %v4135_v3 }
 0x43b   :  { %1606 = vmatpush1.msra.mxu0 %v3770_v49  ;;  %2796 = vmatpush3.msra.mxu1 %v4041_v12 }
 0x43c   :  { %1607 = vmatprep.subr.mxu0 %v3776_v50  ;;  %2797 = vmatprep.subr.mxu1 %v4633_v5 }
 0x43d   :  { %1608 = vmatpush1.msra.mxu0 %v3782_v51  ;;  %2798 = vmatpush3.msra.mxu1 %v4048_v28 }
 0x43e   :  { %1609 = vmatprep.subr.mxu0 %v3788_v52  ;;  %2799 = vmatprep.subr.mxu1 %v4633_v5 }
 0x43f   :  { %1610 = vmatpush1.msra.mxu0 %v3794_v53  ;;  %2800 = vmatpush3.msra.mxu1 %v4055_v46 }
 0x440   :  { %1611 = vmatprep.subr.mxu0 %v3800_v54  ;;  %2801 = vmatprep.subr.mxu1 %v4633_v5 }
 0x441   :  { %1612 = vmatpush1.msra.mxu0 %v3806_v55  ;;  %2802 = vmatpush3.msra.mxu1 %v4062_v4 }
 0x442   :  { %1613 = vmatprep.subr.mxu0 %v3812_v56  ;;  %2803 = vmatprep.subr.mxu1 %v4633_v5 }
 0x443   :  { %1614 = vmatpush1.msra.mxu0 %v3818_v57  ;;  %2804 = vmatpush3.msra.mxu1 %v4069_v19 }
 0x444   :  { %1615 = vmatprep.subr.mxu0 %v3824_v58  ;;  %2805 = vmatprep.subr.mxu1 %v4633_v5 }
 0x445   :  { %1616 = vmatpush1.msra.mxu0 %v3830_v16  ;;  %2806 = vmatpush3.msra.mxu1 %v4076_v61 }
 0x446   :  { %1617 = vmatprep.subr.mxu0 %v3836_v18  ;;  %2807 = vmatprep.subr.mxu1 %v4633_v5 }
 0x447   :  { %1618 = vmatpush1.msra.mxu0 %v3842_v21  ;;  %2808 = vmatpush3.msra.mxu1 %v4083_v45 }
 0x448   :  { %1619 = vmatprep.subr.mxu0 %v3848_v23  ;;  %2809 = vmatprep.subr.mxu1 %v4633_v5 }
 0x449   :  { %1620 = vmatpush1.msra.mxu0 %v3854_v27  ;;  %2810 = vmatpush3.msra.mxu1 %v4090_v62 }
 0x44a   :  { %1621 = vmatprep.subr.mxu0 %v3859_v31  ;;  %2811 = vmatprep.subr.mxu1 %v4633_v5 }
 0x44b   :  { %1622 = vmatpush1.msra.mxu0 %v3864_v32  ;;  %2812 = vmatpush3.msra.mxu1 %v4095_v26 }
 0x44c   :  { %1623 = vmatprep.subr.mxu0 %v3870_v33  ;;  %2813 = vmatprep.subr.mxu1 %v4633_v5 }
 0x44d   :  { %1624 = vmatpush1.msra.mxu0 %v3876_v34  ;;  %2814 = vmatpush3.msra.mxu1 %v4102_v17 }
 0x44e   :  { %1625 = vmatprep.subr.mxu0 %v3882_v35  ;;  %2815 = vmatprep.subr.mxu1 %v4633_v5 }
 0x44f   :  { %1626 = vmatpush1.msra.mxu0 %v3893_v37  ;;  %2816 = vmatpush3.msra.mxu1 %v4109_v1 }
 0x450   :  { %1627 = vmatprep.subr.mxu0 %v3905_v39  ;;  %2817 = vmatprep.subr.mxu1 %v4633_v5 }
 0x451   :  { %1628 = vmatpush1.msra.mxu0 %v3917_v47  ;;  %2818 = vmatpush3.msra.mxu1 %v3887_v36 }
 0x452   :  { %1629 = vmatprep.subr.mxu0 %v3924_v59  ;;  %2819 = vmatprep.subr.mxu1 %v4633_v5 }
 0x453   :  { %1630 = vmatpush1.msra.mxu0 %v3936_v0  ;;  %2820 = vmatpush3.msra.mxu1 %v3899_v38 }
 0x454   :  { %1631 = vmatprep.subr.mxu0 %v3943_v20  ;;  %2821 = vmatprep.subr.mxu1 %v4633_v5 }
 0x455   :  { %1632 = vmatpush1.msra.mxu0 %v4667_v30  ;;  %2822 = vmatpush3.msra.mxu1 %v4668_v63 }
 0x456   :  { %1633 = vmatprep.subr.mxu0 %v4669_v7  ;;  %2823 = vmatprep.subr.mxu1 %v4633_v5 }
 0x457   :  { %1634 = vmatpush1.msra.mxu0 %v4670_v44  ;;  %2824 = vmatpush3.msra.mxu1 %v4671_v6 }
 0x458   :  { %1635 = vmatprep.subr.mxu0 %v4672_v8  ;;  %2825 = vmatprep.subr.mxu1 %v4633_v5 }
 0x459   :  { %1636 = vmatpush1.msra.mxu0 %v4673_v11  ;;  %1669 = vmatprep.mubr.f32.mxu0 %v4633_v5 }
 0x45a   :  { %2826 = vmatpush3.msra.mxu1 %v4674_v29  ;;  %2827 = vmatprep.mubr.msk.f32.mxu1 %vm3027_vm1, %v4633_v5 }
 0x45b   :  { %1846 = vmatprep.subr.mxu0 %v4675_v9  ;;  %2830 = vmatprep.subr.mxu1 %v4633_v5  ;;  %v4679_v9 = vld [vmem:[#allocation31_spill] sm:$0xff] }
 0x4fa   :  { %v1430_v41 = vpop.f32.mrf.mxu0  ;;  %v1501_v40 = vpop.f32.mrf.mxu1 }
 0x4fb   :  { %v1431_v22 = vadd.f32 %v1430_v41, %v1352_v43 }
 0x4fc   :  { %v1432_v25 = vpop.f32.mrf.mxu0  ;;  %v2794_v24 = vpop.f32.mrf.mxu1 }
 0x4fd   :  { %v1505_v42 = vadd.f32 %v1431_v22, %v4678_v10  ;;  %v1433_v13 = vadd.f32 %v1432_v25, %v1356_v15  ;;  %v1360_v22 = vrot.slane %v1347_v14, %v3559_v2 }
 0x4ff   :  { %v1506_v29 = vmax.f32 %v1505_v42, -30.0  ;;  %v1515_v11 = vadd.f32 %v1433_v13, %v4679_v9  ;;  %v1502_v24 = vadd.f32 %v1501_v40, %v1360_v22 }
 0x501   :  { %v1507_v8 = vsub.f32 0.0, %v1506_v29  ;;  %v1516_v6 = vmax.f32 %v1515_v11, -30.0 }
 0x503   :  { %v1508_v44 = vmul.f32 1.442695, %v1507_v8  ;;  %v1517_v7 = vsub.f32 0.0, %v1516_v6  ;;  %v4680_v8 = vld [vmem:[#allocation18_spill] sm:$0xff] }
 0x505   :  { %2986 = vpow2.f32 %v1508_v44  ;;  %v1518_v63 = vmul.f32 1.442695, %v1517_v7 }
 0x507   :  { %2988 = vpow2.f32 %v1518_v63 }
 0x512   :  { %v2987_v48 = vpop.eup %2986 }
 0x513   :  { %v1510_v60 = vadd.f32 1.0, %v2987_v48 }
 0x514   :  { %v2989_v30 = vpop.eup %2988 }
 0x515   :  { %2990 = vrcp.f32 %v1510_v60  ;;  %v1520_v43 = vadd.f32 1.0, %v2989_v30 }
 0x517   :  { %2992 = vrcp.f32 %v1520_v43 }
 0x522   :  { %v2991_v41 = vpop.eup %2990 }
 0x523   :  { %v1512_v15 = vmul.f32 %v2991_v41, %v1510_v60 }
 0x524   :  { %v2993_v11 = vpop.eup %2992 }
 0x525   :  { %v1513_v25 = vsub.f32 2.0, %v1512_v15  ;;  %v1522_v7 = vmul.f32 %v2993_v11, %v1520_v43 }
 0x527   :  { %v1514_v13 = vmul.f32 %v2991_v41, %v1513_v25  ;;  %v1523_v63 = vsub.f32 2.0, %v1522_v7 }
 0x529   :  { %v1525_v29 = vmul.f32 %v1514_v13, %v1502_v24  ;;  %v1524_v44 = vmul.f32 %v2993_v11, %v1523_v63 }
 0x52b   :  { %v1526_v6 = vadd.f32 %v1525_v29, %v4680_v8  ;;  %v1528_v48 = vsub.f32 1.0, %v1524_v44  ;;  %v1530_v30 = vmul.f32 %v1524_v44, %v4135_v3 }
 0x52d   :  { %2994 = vtanh.f32 %v1526_v6  ;;  %v4693_v6 = vld [vmem:[#allocation17_spill] sm:$0xff] }
 0x53a   :  { %v2995_v10 = vpop.eup %2994 }
 0x53b   :  { %v1529_v42 = vmul.f32 %v2995_v10, %v1528_v48 }
 0x53d   :  { %v4216_v9 = vadd.f32 %v1530_v30, %v1529_v42 }
 0x53f   :  { %1670 = vmatmul.mubr.f32.vlgmr.msra.gmra.mxu0 %v4216_v9  ;;  %2828 = vmatmul.mubr.f32.vlgmr.msra.gmra.mxu1 %v4216_v9 }
 0x540   :  { %1847 = vmatpush1.msra.mxu0 %v3770_v49  ;;  %2831 = vmatpush3.msra.mxu1 %v4041_v12  ;;  %v4681_v49 = vld [vmem:[#allocation12_spill] sm:$0xff] }
 0x541   :  { %1848 = vmatprep.subr.mxu0 %v3776_v50  ;;  %2832 = vmatprep.subr.mxu1 %v4633_v5  ;;  %v4682_v50 = vld [vmem:[#allocation11_spill] sm:$0xff] }
 0x542   :  { %1849 = vmatpush1.msra.mxu0 %v3782_v51  ;;  %2833 = vmatpush3.msra.mxu1 %v4048_v28  ;;  %v4683_v51 = vld [vmem:[#allocation8_spill] sm:$0xff] }
 0x543   :  { %1850 = vmatprep.subr.mxu0 %v3788_v52  ;;  %2834 = vmatprep.subr.mxu1 %v4633_v5  ;;  %v4684_v52 = vld [vmem:[#allocation9_spill] sm:$0xff] }
 0x544   :  { %1851 = vmatpush1.msra.mxu0 %v3794_v53  ;;  %2835 = vmatpush3.msra.mxu1 %v4055_v46  ;;  %v4685_v53 = vld [vmem:[#allocation6_spill] sm:$0xff] }
 0x545   :  { %1852 = vmatprep.subr.mxu0 %v3800_v54  ;;  %2836 = vmatprep.subr.mxu1 %v4633_v5  ;;  %v4686_v54 = vld [vmem:[#allocation13_spill] sm:$0xff] }
 0x546   :  { %1853 = vmatpush1.msra.mxu0 %v3806_v55  ;;  %2837 = vmatpush3.msra.mxu1 %v4062_v4  ;;  %v4687_v55 = vld [vmem:[#allocation21_spill] sm:$0xff] }
 0x547   :  { %1854 = vmatprep.subr.mxu0 %v3812_v56  ;;  %2838 = vmatprep.subr.mxu1 %v4633_v5  ;;  %v4688_v56 = vld [vmem:[#allocation7_spill] sm:$0xff] }
 0x548   :  { %1855 = vmatpush1.msra.mxu0 %v3818_v57  ;;  %2839 = vmatpush3.msra.mxu1 %v4069_v19  ;;  %v1588_v57 = vld [vmem:[%s4555_s5] sm:$0x7] }
 0x549   :  { %1856 = vmatprep.subr.mxu0 %v3824_v58  ;;  %2840 = vmatprep.subr.mxu1 %v4633_v5  ;;  %v4689_v58 = vld [vmem:[#allocation22_spill] sm:$0xff]  ;;  %v1601_v15 = vrot.slane %v1588_v57, %v3559_v2 }
 0x54a   :  { %1857 = vmatpush1.msra.mxu0 %v3830_v16  ;;  %2841 = vmatpush3.msra.mxu1 %v4076_v61  ;;  %v1593_v16 = vrot.slane %v1588_v57, %v4689_v58 }
 0x54b   :  { %1858 = vmatprep.subr.mxu0 %v3836_v18  ;;  %2842 = vmatprep.subr.mxu1 %v4633_v5  ;;  %v4690_v18 = vld [vmem:[#allocation24_spill] sm:$0xff] }
 0x54c   :  { %1859 = vmatpush1.msra.mxu0 %v3842_v21  ;;  %2843 = vmatpush3.msra.mxu1 %v4083_v45  ;;  %v1597_v21 = vrot.slane %v1588_v57, %v4690_v18  ;;  %v2043_v57 = vld [vmem:[%s4552_s3 + $0xa8] sm:$0xff] }
 0x54d   :  { %1860 = vmatprep.subr.mxu0 %v3848_v23  ;;  %2844 = vmatprep.subr.mxu1 %v4633_v5 }
 0x54e   :  { %1861 = vmatpush1.msra.mxu0 %v3854_v27  ;;  %2845 = vmatpush3.msra.mxu1 %v4090_v62 }
 0x54f   :  { %1862 = vmatprep.subr.mxu0 %v3859_v31  ;;  %2846 = vmatprep.subr.mxu1 %v4633_v5 }
 0x550   :  { %1863 = vmatpush1.msra.mxu0 %v3864_v32  ;;  %2847 = vmatpush3.msra.mxu1 %v4095_v26 }
 0x551   :  { %1864 = vmatprep.subr.mxu0 %v3870_v33  ;;  %2848 = vmatprep.subr.mxu1 %v4633_v5 }
 0x552   :  { %1865 = vmatpush1.msra.mxu0 %v3876_v34  ;;  %2849 = vmatpush3.msra.mxu1 %v4102_v17  ;;  %v4691_v34 = vld [vmem:[#allocation32_spill] sm:$0xff] }
 0x553   :  { %1866 = vmatprep.subr.mxu0 %v3882_v35  ;;  %2850 = vmatprep.subr.mxu1 %v4633_v5 }
 0x554   :  { %1867 = vmatpush1.msra.mxu0 %v3893_v37  ;;  %2851 = vmatpush3.msra.mxu1 %v4109_v1 }
 0x555   :  { %1868 = vmatprep.subr.mxu0 %v3905_v39  ;;  %2852 = vmatprep.subr.mxu1 %v4633_v5 }
 0x556   :  { %1869 = vmatpush1.msra.mxu0 %v3917_v47  ;;  %2853 = vmatpush3.msra.mxu1 %v3887_v36 }
 0x557   :  { %1870 = vmatprep.subr.mxu0 %v3924_v59  ;;  %2854 = vmatprep.subr.mxu1 %v4633_v5 }
 0x558   :  { %1871 = vmatpush1.msra.mxu0 %v3936_v0  ;;  %2855 = vmatpush3.msra.mxu1 %v3899_v38  ;;  %v4692_v38 = vld [vmem:[#allocation33_spill] sm:$0xff] }
 0x559   :  { %1872 = vmatprep.subr.mxu0 %v3943_v20  ;;  %2856 = vmatprep.subr.mxu1 %v4633_v5 }
 0x55a   :  { %1873 = vmatpush1.msra.mxu0 %v4681_v49  ;;  %2857 = vmatpush3.msra.mxu1 %v4682_v50 }
 0x55b   :  { %1874 = vmatprep.subr.mxu0 %v4683_v51  ;;  %2858 = vmatprep.subr.mxu1 %v4633_v5  ;;  %v2052_v51 = vld [vmem:[%s4552_s3 + $0xf0] sm:$0xff] }
 0x55c   :  { %1875 = vmatpush1.msra.mxu0 %v4684_v52  ;;  %2859 = vmatpush3.msra.mxu1 %v4685_v53  ;;  %v2050_v52 = vld [vmem:[%s4552_s3 + $0xe0] sm:$0xff]  ;;  %v2049_v53 = vld [vmem:[%s4552_s3 + $0xd8] sm:$0xff] }
 0x55d   :  { %1876 = vmatprep.subr.mxu0 %v4686_v54  ;;  %2860 = vmatprep.subr.mxu1 %v4633_v5  ;;  %v2047_v54 = vld [vmem:[%s4552_s3 + $0xc8] sm:$0xff] }
 0x55e   :  { %1877 = vmatpush1.msra.mxu0 %v4687_v55  ;;  %1910 = vmatprep.mubr.f32.mxu0 %v4633_v5  ;;  %v2046_v55 = vld [vmem:[%s4552_s3 + $0xc0] sm:$0xff] }
 0x55f   :  { %2861 = vmatpush3.msra.mxu1 %v4688_v56  ;;  %2862 = vmatprep.mubr.msk.f32.mxu1 %vm3027_vm1, %v4633_v5  ;;  %v2044_v56 = vld [vmem:[%s4552_s3 + $0xb0] sm:$0xff] }
 0x560   :  { %2865 = vmatprep.subr.mxu1 %v4633_v5 }
 0x5ff   :  { %v1671_v23 = vpop.f32.mrf.mxu0  ;;  %v1742_v27 = vpop.f32.mrf.mxu1 }
 0x600   :  { %v1672_v31 = vadd.f32 %v1671_v23, %v1593_v16  ;;  %v1743_v13 = vadd.f32 %v1742_v27, %v1601_v15  ;;  %v2041_v16 = vld [vmem:[%s4552_s3 + $0x98] sm:$0xff]  ;;  %v2038_v23 = vld [vmem:[%s4552_s3 + $0x80] sm:$0xff] }
 0x601   :  { %v1673_v32 = vpop.f32.mrf.mxu0  ;;  %v2829_v33 = vpop.f32.mrf.mxu1  ;;  %v2037_v27 = vld [vmem:[%s4552_s3 + $0x78] sm:$0xff] }
 0x602   :  { %v1746_v35 = vadd.f32 %v1672_v31, %v4691_v34  ;;  %v1674_v36 = vadd.f32 %v1673_v32, %v1597_v21  ;;  %v2040_v21 = vld [vmem:[%s4552_s3 + $0x90] sm:$0xff]  ;;  %v2035_v32 = vld [vmem:[%s4552_s3 + $0x68] sm:$0xff]  ;;  %v2033_v33 = vld [vmem:[%s4552_s3 + $0x58] sm:$0xff] }
 0x603   :  { %v2036_v31 = vld [vmem:[%s4552_s3 + $0x70] sm:$0xff]  ;;  %v2034_v34 = vld [vmem:[%s4552_s3 + $0x60] sm:$0xff] }
 0x604   :  { %v1747_v37 = vmax.f32 %v1746_v35, -30.0  ;;  %v1756_v39 = vadd.f32 %v1674_v36, %v4692_v38  ;;  %v2030_v35 = vld [vmem:[%s4552_s3 + $0x40] sm:$0xff]  ;;  %v2032_v36 = vld [vmem:[%s4552_s3 + $0x50] sm:$0xff]  ;;  %v2027_v38 = vld [vmem:[%s4552_s3 + $0x28] sm:$0xff] }
 0x606   :  { %v1748_v47 = vsub.f32 0.0, %v1747_v37  ;;  %v1757_v59 = vmax.f32 %v1756_v39, -30.0  ;;  %v2031_v37 = vld [vmem:[%s4552_s3 + $0x48] sm:$0xff]  ;;  %v2029_v39 = vld [vmem:[%s4552_s3 + $0x38] sm:$0xff] }
 0x608   :  { %v1749_v0 = vmul.f32 1.442695, %v1748_v47  ;;  %v1758_v20 = vsub.f32 0.0, %v1757_v59  ;;  %v2028_v47 = vld [vmem:[%s4552_s3 + $0x30] sm:$0xff] }
 0x609   :  { %v2024_v59 = vld [vmem:[%s4552_s3 + $0x10] sm:$0xff] }
 0x60a   :  { %2996 = vpow2.f32 %v1749_v0  ;;  %v1759_v14 = vmul.f32 1.442695, %v1758_v20  ;;  %v2026_v0 = vld [vmem:[%s4552_s3 + $0x20] sm:$0xff]  ;;  %v2025_v20 = vld [vmem:[%s4552_s3 + $0x18] sm:$0xff] }
 0x60c   :  { %2998 = vpow2.f32 %v1759_v14  ;;  %v2023_v14 = vld [vmem:[%s4552_s3 + $0x8] sm:$0xff] }
 0x617   :  { %v2997_v60 = vpop.eup %2996 }
 0x618   :  { %v1751_v40 = vadd.f32 1.0, %v2997_v60  ;;  %v2022_v60 = vld [vmem:[%s4552_s3] sm:$0xff] }
 0x619   :  { %v2999_v43 = vpop.eup %2998 }
 0x61a   :  { %3000 = vrcp.f32 %v1751_v40  ;;  %v1761_v41 = vadd.f32 1.0, %v2999_v43 }
 0x61c   :  { %3002 = vrcp.f32 %v1761_v41 }
 0x627   :  { %v3001_v22 = vpop.eup %3000 }
 0x628   :  { %v1753_v25 = vmul.f32 %v3001_v22, %v1751_v40  ;;  %v2281_v40 = vld [vmem:[%s4556_s6 + $0x78] sm:$0xff] }
 0x629   :  { %v3003_v8 = vpop.eup %3002 }
 0x62a   :  { %v1754_v24 = vsub.f32 2.0, %v1753_v25  ;;  %v1763_v63 = vmul.f32 %v3003_v8, %v1761_v41 }
 0x62c   :  { %v1755_v29 = vmul.f32 %v3001_v22, %v1754_v24  ;;  %v1764_v44 = vsub.f32 2.0, %v1763_v63 }
 0x62e   :  { %v1766_v11 = vmul.f32 %v1755_v29, %v1743_v13  ;;  %v1765_v48 = vmul.f32 %v3003_v8, %v1764_v44  ;;  %v4694_v29 = vld [vmem:[#allocation34_spill] sm:$0xff] }
 0x630   :  { %v1767_v7 = vadd.f32 %v1766_v11, %v4693_v6  ;;  %v1769_v10 = vsub.f32 1.0, %v1765_v48  ;;  %v1771_v49 = vmul.f32 %v1765_v48, %v4216_v9 }
 0x632   :  { %3004 = vtanh.f32 %v1767_v7  ;;  %v4695_v7 = vld [vmem:[#allocation35_spill] sm:$0xff] }
 0x63f   :  { %v3005_v42 = vpop.eup %3004 }
 0x640   :  { %v1770_v30 = vmul.f32 %v3005_v42, %v1769_v10 }
 0x642   :  { %v4296_v50 = vadd.f32 %v1771_v49, %v1770_v30 }
 0x644   :  { %1911 = vmatmul.mubr.f32.vlgmr.msra.gmra.mxu0 %v4296_v50  ;;  %2863 = vmatmul.mubr.f32.vlgmr.msra.gmra.mxu1 %v4296_v50 }
 0x645   :  { %2866 = vmatpush3.msra.mxu1 %v4041_v12  ;;  %2151 = vmatprep.mubr.f32.mxu0 %v4633_v5  ;;  %v2068_v12 = vld [vmem:[%s4552_s3 + $0x170] sm:$0xff] }
 0x646   :  { %2867 = vmatprep.subr.mxu1 %v4633_v5  ;;  %2897 = vmatprep.mubr.msk.f32.mxu1 %vm3027_vm1, %v4633_v5 }
 0x647   :  { %2868 = vmatpush3.msra.mxu1 %v4048_v28  ;;  %2087 = vmatprep.subr.mxu0 %v2068_v12  ;;  %v2067_v28 = vld [vmem:[%s4552_s3 + $0x168] sm:$0xff] }
 0x648   :  { %2869 = vmatprep.subr.mxu1 %v4633_v5  ;;  %2088 = vmatpush1.msra.mxu0 %v2067_v28 }
 0x649   :  { %2870 = vmatpush3.msra.mxu1 %v4055_v46  ;;  %v2065_v46 = vld [vmem:[%s4552_s3 + $0x158] sm:$0xff] }
 0x64a   :  { %2871 = vmatprep.subr.mxu1 %v4633_v5  ;;  %2089 = vmatprep.subr.mxu0 %v2065_v46 }
 0x64b   :  { %2872 = vmatpush3.msra.mxu1 %v4062_v4  ;;  %v2064_v4 = vld [vmem:[%s4552_s3 + $0x150] sm:$0xff] }
 0x64c   :  { %2873 = vmatprep.subr.mxu1 %v4633_v5  ;;  %2090 = vmatpush1.msra.mxu0 %v2064_v4 }
 0x64d   :  { %2874 = vmatpush3.msra.mxu1 %v4069_v19  ;;  %v2062_v19 = vld [vmem:[%s4552_s3 + $0x140] sm:$0xff] }
 0x64e   :  { %2875 = vmatprep.subr.mxu1 %v4633_v5  ;;  %2091 = vmatprep.subr.mxu0 %v2062_v19 }
 0x64f   :  { %2876 = vmatpush3.msra.mxu1 %v4076_v61  ;;  %v2061_v61 = vld [vmem:[%s4552_s3 + $0x138] sm:$0xff] }
 0x650   :  { %2877 = vmatprep.subr.mxu1 %v4633_v5  ;;  %2092 = vmatpush1.msra.mxu0 %v2061_v61 }
 0x651   :  { %2878 = vmatpush3.msra.mxu1 %v4083_v45  ;;  %v2059_v45 = vld [vmem:[%s4552_s3 + $0x128] sm:$0xff] }
 0x652   :  { %2879 = vmatprep.subr.mxu1 %v4633_v5  ;;  %2093 = vmatprep.subr.mxu0 %v2059_v45 }
 0x653   :  { %2880 = vmatpush3.msra.mxu1 %v4090_v62  ;;  %v2058_v62 = vld [vmem:[%s4552_s3 + $0x120] sm:$0xff] }
 0x654   :  { %2881 = vmatprep.subr.mxu1 %v4633_v5  ;;  %2094 = vmatpush1.msra.mxu0 %v2058_v62 }
 0x655   :  { %2882 = vmatpush3.msra.mxu1 %v4095_v26  ;;  %v2056_v26 = vld [vmem:[%s4552_s3 + $0x110] sm:$0xff] }
 0x656   :  { %2883 = vmatprep.subr.mxu1 %v4633_v5  ;;  %2095 = vmatprep.subr.mxu0 %v2056_v26 }
 0x657   :  { %2884 = vmatpush3.msra.mxu1 %v4102_v17  ;;  %v2055_v17 = vld [vmem:[%s4552_s3 + $0x108] sm:$0xff] }
 0x658   :  { %2885 = vmatprep.subr.mxu1 %v4633_v5  ;;  %2096 = vmatpush1.msra.mxu0 %v2055_v17 }
 0x659   :  { %2886 = vmatpush3.msra.mxu1 %v4109_v1  ;;  %v2053_v1 = vld [vmem:[%s4552_s3 + $0xf8] sm:$0xff] }
 0x65a   :  { %2887 = vmatprep.subr.mxu1 %v4633_v5  ;;  %2097 = vmatprep.subr.mxu0 %v2053_v1 }
 0x65b   :  { %2098 = vmatpush1.msra.mxu0 %v2052_v51  ;;  %2888 = vmatpush3.msra.mxu1 %v2036_v31  ;;  %v4696_v51 = vld [vmem:[#allocation20_spill] sm:$0xff]  ;;  %v4697_v31 = vld [vmem:[#allocation37_spill] sm:$0xff] }
 0x65c   :  { %2099 = vmatprep.subr.mxu0 %v2050_v52  ;;  %2889 = vmatprep.subr.mxu1 %v4633_v5 }
 0x65d   :  { %2100 = vmatpush1.msra.mxu0 %v2049_v53  ;;  %2890 = vmatpush3.msra.mxu1 %v2033_v33  ;;  %v2278_v33 = vld [vmem:[%s4556_s6 + $0x60] sm:$0xff] }
 0x65e   :  { %2101 = vmatprep.subr.mxu0 %v2047_v54  ;;  %2891 = vmatprep.subr.mxu1 %v4633_v5 }
 0x65f   :  { %2102 = vmatpush1.msra.mxu0 %v2046_v55  ;;  %2892 = vmatpush3.msra.mxu1 %v2030_v35  ;;  %v2276_v35 = vld [vmem:[%s4556_s6 + $0x50] sm:$0xff] }
 0x660   :  { %2103 = vmatprep.subr.mxu0 %v2044_v56  ;;  %2893 = vmatprep.subr.mxu1 %v4633_v5 }
 0x661   :  { %2104 = vmatpush1.msra.mxu0 %v2043_v57  ;;  %2894 = vmatpush3.msra.mxu1 %v2027_v38  ;;  %v2273_v38 = vld [vmem:[%s4556_s6 + $0x38] sm:$0xff] }
 0x662   :  { %2105 = vmatprep.subr.mxu0 %v2041_v16  ;;  %2895 = vmatprep.subr.mxu1 %v4633_v5  ;;  %v1829_v5 = vld [vmem:[%s4555_s5] sm:$0x7] }
 0x663   :  { %2106 = vmatpush1.msra.mxu0 %v2040_v21  ;;  %2896 = vmatpush3.msra.mxu1 %v2024_v59  ;;  %v1834_v43 = vrot.slane %v1829_v5, %v4689_v58  ;;  %v1838_v41 = vrot.slane %v1829_v5, %v4690_v18  ;;  %v1842_v19 = vrot.slane %v1829_v5, %v3559_v2  ;;  %v2270_v59 = vld [vmem:[%s4556_s6 + $0x20] sm:$0xff]  ;;  %v4699_v5 = vld [vmem:[#allocation23_spill] sm:$0xff] }
 0x664   :  { %2107 = vmatprep.subr.mxu0 %v2038_v23 }
 0x665   :  { %2108 = vmatpush1.msra.mxu0 %v2037_v27  ;;  %v2280_v27 = vld [vmem:[%s4556_s6 + $0x70] sm:$0xff] }
 0x666   :  { %2109 = vmatprep.subr.mxu0 %v2035_v32  ;;  %v2279_v32 = vld [vmem:[%s4556_s6 + $0x68] sm:$0xff] }
 0x667   :  { %2110 = vmatpush1.msra.mxu0 %v2034_v34  ;;  %v2277_v34 = vld [vmem:[%s4556_s6 + $0x58] sm:$0xff] }
 0x668   :  { %2111 = vmatprep.subr.mxu0 %v2032_v36  ;;  %v2275_v36 = vld [vmem:[%s4556_s6 + $0x48] sm:$0xff] }
 0x669   :  { %2112 = vmatpush1.msra.mxu0 %v2031_v37  ;;  %v2274_v37 = vld [vmem:[%s4556_s6 + $0x40] sm:$0xff] }
 0x66a   :  { %2113 = vmatprep.subr.mxu0 %v2029_v39  ;;  %v2272_v39 = vld [vmem:[%s4556_s6 + $0x30] sm:$0xff] }
 0x66b   :  { %2114 = vmatpush1.msra.mxu0 %v2028_v47  ;;  %v2271_v47 = vld [vmem:[%s4556_s6 + $0x28] sm:$0xff] }
 0x66c   :  { %2115 = vmatprep.subr.mxu0 %v2026_v0  ;;  %v2269_v0 = vld [vmem:[%s4556_s6 + $0x18] sm:$0xff] }
 0x66d   :  { %2116 = vmatpush1.msra.mxu0 %v2025_v20  ;;  %v2268_v20 = vld [vmem:[%s4556_s6 + $0x10] sm:$0xff] }
 0x66e   :  { %2117 = vmatprep.subr.mxu0 %v2023_v14  ;;  %v2267_v14 = vld [vmem:[%s4556_s6 + $0x8] sm:$0xff] }
 0x66f   :  { %2118 = vmatpush1.msra.mxu0 %v2022_v60  ;;  %v2266_v60 = vld [vmem:[%s4556_s6] sm:$0xff] }
 0x670   :  { %2900 = vmatprep.subr.mxu0 %v2281_v40 }
 0x704   :  { %v1912_v22 = vpop.f32.mrf.mxu0  ;;  %v1983_v15 = vpop.f32.mrf.mxu1 }
 0x705   :  { %v1913_v25 = vadd.f32 %v1912_v22, %v1834_v43  ;;  %v1984_v62 = vadd.f32 %v1983_v15, %v1842_v19  ;;  %v2070_v43 = vld [vmem:[%s4555_s5] sm:$0x7] }
 0x706   :  { %v1914_v24 = vpop.f32.mrf.mxu0  ;;  %v2864_v13 = vpop.f32.mrf.mxu1  ;;  %v2079_v22 = vrot.slane %v2070_v43, %v4690_v18 }
 0x707   :  { %v1987_v11 = vadd.f32 %v1913_v25, %v4694_v29  ;;  %v1915_v8 = vadd.f32 %v1914_v24, %v1838_v41  ;;  %v2075_v41 = vrot.slane %v2070_v43, %v4689_v58 }
 0x709   :  { %v1988_v6 = vmax.f32 %v1987_v11, -30.0  ;;  %v1997_v63 = vadd.f32 %v1915_v8, %v4695_v7  ;;  %v4701_v11 = vld [vmem:[#allocation10_spill] sm:$0xff]  ;;  %v4702_v8 = vld [vmem:[#allocation36_spill] sm:$0xff] }
 0x70b   :  { %v1989_v44 = vsub.f32 0.0, %v1988_v6  ;;  %v1998_v48 = vmax.f32 %v1997_v63, -30.0 }
 0x70d   :  { %v1990_v10 = vmul.f32 1.442695, %v1989_v44  ;;  %v1999_v42 = vsub.f32 0.0, %v1998_v48 }
 0x70f   :  { %3006 = vpow2.f32 %v1990_v10  ;;  %v2000_v30 = vmul.f32 1.442695, %v1999_v42 }
 0x711   :  { %3008 = vpow2.f32 %v2000_v30 }
 0x71c   :  { %v3007_v49 = vpop.eup %3006 }
 0x71d   :  { %v1992_v12 = vadd.f32 1.0, %v3007_v49 }
 0x71e   :  { %v3009_v28 = vpop.eup %3008 }
 0x71f   :  { %3010 = vrcp.f32 %v1992_v12  ;;  %v2002_v46 = vadd.f32 1.0, %v3009_v28 }
 0x721   :  { %3012 = vrcp.f32 %v2002_v46 }
 0x72c   :  { %v3011_v4 = vpop.eup %3010 }
 0x72d   :  { %v1994_v61 = vmul.f32 %v3011_v4, %v1992_v12  ;;  %v2433_v12 = vld [vmem:[%s4557_s7] ss:$0 sm:$0xff] }
 0x72e   :  { %v3013_v1 = vpop.eup %3012 }
 0x72f   :  { %v1995_v45 = vsub.f32 2.0, %v1994_v61  ;;  %v2004_v53 = vmul.f32 %v3013_v1, %v2002_v46 }
 0x731   :  { %v1996_v26 = vmul.f32 %v3011_v4, %v1995_v45  ;;  %v2005_v54 = vsub.f32 2.0, %v2004_v53 }
 0x733   :  { %v2007_v17 = vmul.f32 %v1996_v26, %v1984_v62  ;;  %v2006_v55 = vmul.f32 %v3013_v1, %v2005_v54 }
 0x735   :  { %v2008_v52 = vadd.f32 %v2007_v17, %v4696_v51  ;;  %v2010_v56 = vsub.f32 1.0, %v2006_v55  ;;  %v2012_v21 = vmul.f32 %v2006_v55, %v4296_v50 }
 0x737   :  { %3014 = vtanh.f32 %v2008_v52  ;;  %v2083_v52 = vrot.slane %v2070_v43, %v3559_v2 }
 0x744   :  { %v3015_v57 = vpop.eup %3014 }
 0x745   :  { %v2011_v16 = vmul.f32 %v3015_v57, %v2010_v56 }
 0x747   :  { %v4453_v23 = vadd.f32 %v2012_v21, %v2011_v16 }
 0x749   :  { %2152 = vmatmul.mubr.f32.vlgmr.msra.gmra.mxu0 %v4453_v23  ;;  %2898 = vmatmul.mubr.f32.vlgmr.msra.gmra.mxu1 %v4453_v23 }
 0x74a   :  { %2901 = vmatpush3.msra.mxu0 %v2281_v40  ;;  %2932 = vmatprep.mubr.f32.mxu0 %v4697_v31  ;;  %v4698_v40 = vld [vmem:[#allocation4_spill] sm:$0xff]  ;;  %v4703_v31 = vld [vmem:[#allocation19_spill] sm:$0xff] }
 0x74b   :  { %2902 = vmatprep.subr.mxu0 %v2280_v27 }
 0x74c   :  { %2903 = vmatpush3.msra.mxu0 %v2280_v27 }
 0x74d   :  { %2904 = vmatprep.subr.mxu0 %v2279_v32 }
 0x74e   :  { %2905 = vmatpush3.msra.mxu0 %v2279_v32 }
 0x74f   :  { %2906 = vmatprep.subr.mxu0 %v2278_v33 }
 0x750   :  { %2907 = vmatpush3.msra.mxu0 %v2278_v33 }
 0x751   :  { %2908 = vmatprep.subr.mxu0 %v2277_v34 }
 0x752   :  { %2909 = vmatpush3.msra.mxu0 %v2277_v34 }
 0x753   :  { %2910 = vmatprep.subr.mxu0 %v2276_v35 }
 0x754   :  { %2911 = vmatpush3.msra.mxu0 %v2276_v35 }
 0x755   :  { %2912 = vmatprep.subr.mxu0 %v2275_v36 }
 0x756   :  { %2913 = vmatpush3.msra.mxu0 %v2275_v36 }
 0x757   :  { %2914 = vmatprep.subr.mxu0 %v2274_v37 }
 0x758   :  { %2915 = vmatpush3.msra.mxu0 %v2274_v37 }
 0x759   :  { %2916 = vmatprep.subr.mxu0 %v2273_v38 }
 0x75a   :  { %2917 = vmatpush3.msra.mxu0 %v2273_v38 }
 0x75b   :  { %2918 = vmatprep.subr.mxu0 %v2272_v39 }
 0x75c   :  { %2919 = vmatpush3.msra.mxu0 %v2272_v39 }
 0x75d   :  { %2920 = vmatprep.subr.mxu0 %v2271_v47 }
 0x75e   :  { %2921 = vmatpush3.msra.mxu0 %v2271_v47 }
 0x75f   :  { %2922 = vmatprep.subr.mxu0 %v2270_v59 }
 0x760   :  { %2923 = vmatpush3.msra.mxu0 %v2270_v59 }
 0x761   :  { %2924 = vmatprep.subr.mxu0 %v2269_v0 }
 0x762   :  { %2925 = vmatpush3.msra.mxu0 %v2269_v0 }
 0x763   :  { %2926 = vmatprep.subr.mxu0 %v2268_v20 }
 0x764   :  { %2927 = vmatpush3.msra.mxu0 %v2268_v20 }
 0x765   :  { %2928 = vmatprep.subr.mxu0 %v2267_v14 }
 0x766   :  { %2929 = vmatpush3.msra.mxu0 %v2267_v14 }
 0x767   :  { %2930 = vmatprep.subr.mxu0 %v2266_v60 }
 0x768   :  { %2931 = vmatpush3.msra.mxu0 %v2266_v60 }
 0x769   :  { %2933 = vmatmul.mubr.f32.vlgmr.msra.gmra.mxu0 %v4698_v40 }
 0x76a   :  { %2935 = vmatprep.mubr.f32.mxu0 %v4699_v5 }
 0x76d   :  { %2936 = vmatmul.mubr.f32.gmra.mxu0 %v4135_v3  ;;  %v4700_v3 = vld [vmem:[#allocation25_spill] sm:$0xff] }
 0x76e   :  { %2938 = vmatprep.mubr.f32.mxu0 %v4216_v9  ;;  %v198_v9 = vadd.f32 %v4701_v11, %v4700_v3 }
 0x771   :  { %2939 = vmatmul.mubr.f32.gmra.mxu0 %v4296_v50 }
 0x772   :  { %2941 = vmatprep.mubr.f32.mxu0 %v4453_v23 }
 0x809   :  { %v2153_v15 = vpop.f32.mrf.mxu0  ;;  %v2224_v25 = vpop.f32.mrf.mxu1 }
 0x80a   :  { %v2154_v24 = vadd.f32 %v2153_v15, %v2075_v41  ;;  %v2225_v16 = vadd.f32 %v2224_v25, %v2083_v52 }
 0x80b   :  { %v2155_v13 = vpop.f32.mrf.mxu0  ;;  %v2899_v29 = vpop.f32.mrf.mxu1 }
 0x80c   :  { %v2228_v50 = vadd.f32 %v2154_v24, %v4702_v8  ;;  %v2156_v6 = vadd.f32 %v2155_v13, %v2079_v22 }
 0x80e   :  { %v2229_v7 = vmax.f32 %v2228_v50, -30.0  ;;  %v2238_v63 = vadd.f32 %v2156_v6, %v198_v9 }
 0x810   :  { %v2230_v44 = vsub.f32 0.0, %v2229_v7  ;;  %v2239_v48 = vmax.f32 %v2238_v63, -30.0 }
 0x812   :  { %v2231_v10 = vmul.f32 1.442695, %v2230_v44  ;;  %v2240_v42 = vsub.f32 0.0, %v2239_v48 }
 0x814   :  { %3016 = vpow2.f32 %v2231_v10  ;;  %v2241_v58 = vmul.f32 1.442695, %v2240_v42 }
 0x816   :  { %3018 = vpow2.f32 %v2241_v58 }
 0x821   :  { %v3017_v18 = vpop.eup %3016 }
 0x822   :  { %v2233_v30 = vadd.f32 1.0, %v3017_v18 }
 0x823   :  { %v3019_v49 = vpop.eup %3018 }
 0x824   :  { %3020 = vrcp.f32 %v2233_v30  ;;  %v2243_v28 = vadd.f32 1.0, %v3019_v49 }
 0x826   :  { %3022 = vrcp.f32 %v2243_v28 }
 0x829   :  { %v2934_v46 = vpop.f32.mrf.mxu0 }
 0x82a   :  { %v2361_v4 = vadd.f32 %v2934_v46, %v2433_v12 }
 0x82b   :  { %v2355_v19 = vpop.f32.mrf.mxu0 }
 0x82c   :  { %2395 = vst [vmem:[%s4558_s8 + $0x8] sm:$0xff] %v2361_v4  ;;  %v2356_v61 = vadd.f32 %v2433_v12, %v2355_v19 }
 0x82d   :  { %v2937_v45 = vpop.f32.mrf.mxu0 }
 0x82e   :  { %2394 = vst [vmem:[%s4558_s8] sm:$0xff] %v2356_v61  ;;  %v2371_v62 = vadd.f32 %v2937_v45, %v2433_v12 }
 0x82f   :  { %v2365_v26 = vpop.f32.mrf.mxu0 }
 0x830   :  { %2397 = vst [vmem:[%s4558_s8 + $0x18] sm:$0xff] %v2371_v62  ;;  %v2366_v17 = vadd.f32 %v2433_v12, %v2365_v26 }
 0x831   :  { %v3021_v1 = vpop.eup %3020  ;;  %v2940_v51 = vpop.f32.mrf.mxu0 }
 0x832   :  { %v2235_v53 = vmul.f32 %v3021_v1, %v2233_v30  ;;  %2396 = vst [vmem:[%s4558_s8 + $0x10] sm:$0xff] %v2366_v17  ;;  %v2381_v54 = vadd.f32 %v2940_v51, %v2433_v12 }
 0x833   :  { %v2375_v55 = vpop.f32.mrf.mxu0  ;;  %v3023_v27 = vpop.eup %3022 }
 0x834   :  { %v2236_v56 = vsub.f32 2.0, %v2235_v53  ;;  %2399 = vst [vmem:[%s4558_s8 + $0x28] sm:$0xff] %v2381_v54  ;;  %v2376_v57 = vadd.f32 %v2433_v12, %v2375_v55  ;;  %v2245_v33 = vmul.f32 %v3023_v27, %v2243_v28 }
 0x836   :  { %v2237_v21 = vmul.f32 %v3021_v1, %v2236_v56  ;;  %2398 = vst [vmem:[%s4558_s8 + $0x20] sm:$0xff] %v2376_v57  ;;  %v2246_v34 = vsub.f32 2.0, %v2245_v33 }
 0x838   :  { %v2248_v2 = vmul.f32 %v2237_v21, %v2225_v16  ;;  %v2247_v35 = vmul.f32 %v3023_v27, %v2246_v34 }
 0x83a   :  { %v2249_v32 = vadd.f32 %v2248_v2, %v4703_v31  ;;  %v2251_v36 = vsub.f32 1.0, %v2247_v35  ;;  %v2253_v39 = vmul.f32 %v2247_v35, %v4453_v23 }
 0x83c   :  { %3024 = vtanh.f32 %v2249_v32 }
 0x849   :  { %v3025_v37 = vpop.eup %3024 }
 0x84a   :  { %v2252_v38 = vmul.f32 %v3025_v37, %v2251_v36 }
 0x84c   :  { %v2254_v47 = vadd.f32 %v2253_v39, %v2252_v38 }
 0x84e   :  { %2257 = vst [vmem:[%s4559_s9] sm:$0xff] %v2254_v47  ;;  %2942 = vmatmul.mubr.f32.gmra.mxu0 %v2254_v47 }
 0x90e   :  { %v2943_v59 = vpop.f32.mrf.mxu0 }
 0x90f   :  { %v2391_v0 = vadd.f32 %v2943_v59, %v2433_v12 }
 0x910   :  { %v2385_v20 = vpop.f32.mrf.mxu0 }
 0x911   :  { %2401 = vst [vmem:[%s4558_s8 + $0x38] sm:$0xff] %v2391_v0  ;;  %v2386_v14 = vadd.f32 %v2433_v12, %v2385_v20 }
 0x913   :  { %2400 = vst [vmem:[%s4558_s8 + $0x30] sm:$0xff] %v2386_v14 }

</bundles_post_ra>
